<compile_context>
chip_gen: v7x
topology: tpu7x:2x2x1
jax: 0.10.0
libtpu: 0.0.40
codegen_flags: <defaults>
</compile_context>

<pallas_src>
from functools import partial

import jax
import jax.numpy as jnp
from jax.experimental import pallas as pl
from jax.experimental.pallas import tpu as pltpu

EPS = 1e-12  # matches LayerNorm((256,), eps=1e-12) in the PyTorch module


def add_layernorm_kernel(x_ref, y_ref, w_ref, b_ref, o_ref):
    # x_ref, y_ref, o_ref: (TM, H) tiles; w_ref, b_ref: (1, H) resident params.
    H = x_ref.shape[-1]
    inv_h = 1.0 / H  # constant multiply, not a divide

    s = (x_ref[...] + y_ref[...]).astype(jnp.float32)

    # Two-pass statistics: mean, then variance of the centered values.  The
    # extra VPU sweep is free under the HBM-bound regime and avoids the
    # E[x^2] - mean^2 cancellation issue (eps=1e-12 gives no numerical floor).
    mean = jnp.sum(s, axis=-1, keepdims=True) * inv_h
    c = s - mean
    var = jnp.sum(c * c, axis=-1, keepdims=True) * inv_h
    inv = jax.lax.rsqrt(var + EPS)  # EUP rsqrt

    w = w_ref[...].astype(jnp.float32)
    b = b_ref[...].astype(jnp.float32)
    o_ref[...] = (c * inv * w + b).astype(o_ref.dtype)


def _num_tensorcores():
    """Best-effort TensorCore-per-chip query; falls back to 1 (v5e/v6e)."""
    try:
        info = pltpu.get_tpu_info()
        for attr in ("num_cores", "core_count", "num_tensorcores",
                     "tensor_core_count", "tensorcores_per_chip"):
            v = getattr(info, attr, None)
            if isinstance(v, int) and v > 0:
                return v
    except Exception:
        pass
    return 1


@partial(jax.jit, static_argnames=("tm",))
def _add_layernorm_2d(x2, y2, w2, b2, tm):
    R, H = x2.shape
    cost = pl.CostEstimate(
        flops=8 * R * H,                          # add, center, square, scale, affine, reductions
        transcendentals=R,                        # one rsqrt per row
        bytes_accessed=3 * R * H * 4 + 2 * H * 4  # x, y read + out write + params
    )
    return pl.pallas_call(
        add_layernorm_kernel,
        out_shape=jax.ShapeDtypeStruct((R, H), x2.dtype),
        grid_spec=pltpu.PrefetchScalarGridSpec(
            num_scalar_prefetch=0,
            grid=(R // tm,),
            in_specs=[
                pl.BlockSpec((tm, H), lambda i: (i, 0)),
                pl.BlockSpec((tm, H), lambda i: (i, 0)),
                pl.BlockSpec((1, H), lambda i: (0, 0)),
                pl.BlockSpec((1, H), lambda i: (0, 0)),
            ],
            out_specs=pl.BlockSpec((tm, H), lambda i: (i, 0)),
        ),
        compiler_params=pltpu.CompilerParams(
            dimension_semantics=("parallel",),
        ),
        cost_estimate=cost,
    )(x2, y2, w2, b2)


def add_layernorm(x, y, weight, bias, tm=None):
    B, S, H = x.shape
    R = B * S
    if tm is None:
        # Default: one block per TensorCore (grid=(2,) on v7x, grid=(1,) on v5e/v6e).
        n_tc = _num_tensorcores()
        if n_tc > 1 and R % n_tc == 0 and (R // n_tc) % 8 == 0:
            tm = R // n_tc
        else:
            tm = R
    assert R % tm == 0, "row count must be divisible by the row tile"
    assert tm % 8 == 0 or tm == R, "row tile must be sublane-aligned"

    out2 = _add_layernorm_2d(
        x.reshape(R, H), y.reshape(R, H),
        weight.reshape(1, H), bias.reshape(1, H), tm)
    return out2.reshape(B, S, H)


if __name__ == "__main__":
    key = jax.random.PRNGKey(0)
    k1, k2, k3, k4 = jax.random.split(key, 4)

    B, S, H = 1, 384, 256
    x105 = jax.random.normal(k1, (B, S, H), dtype=jnp.float32)
    x71 = jax.random.normal(k2, (B, S, H), dtype=jnp.float32)

    # LayerNorm((256,), elementwise_affine=True) parameters, initialized
    # deterministically in-script (synthetic; not a checkpoint load).
    weight = 1.0 + 0.02 * jax.random.normal(k3, (H,), dtype=jnp.float32)
    bias = 0.02 * jax.random.normal(k4, (H,), dtype=jnp.float32)

    # Plain-JAX reference (same semantics as torch add + LayerNorm, eps=1e-12).
    s = x105 + x71
    mean = jnp.mean(s, axis=-1, keepdims=True)
    var = jnp.mean((s - mean) ** 2, axis=-1, keepdims=True)
    ref = (s - mean) * jax.lax.rsqrt(var + EPS) * weight + bias

    out = add_layernorm(x105, x71, weight, bias)
    out = jax.block_until_ready(out)

    assert out.shape == (B, S, H)
    assert jnp.allclose(out, ref, atol=1e-5, rtol=1e-5), "mismatch vs reference"

    print("KERNEL_OK")
</pallas_src>

<mosaic_0001>
module attributes {stable_mosaic.version = 11 : i64} {
  func.func @add_layernorm_kernel(%arg0: i32, %arg1: memref<384x256xf32, #tpu.memory_space<vmem>>, %arg2: memref<384x256xf32, #tpu.memory_space<vmem>>, %arg3: memref<1x256xf32, #tpu.memory_space<vmem>>, %arg4: memref<1x256xf32, #tpu.memory_space<vmem>>, %arg5: memref<384x256xf32, #tpu.memory_space<vmem>>) attributes {dimension_semantics = [#tpu.dimension_semantics<parallel>], iteration_bounds = array<i64: 1>, scalar_prefetch = 0 : i64, scratch_operands = 0 : i64, tpu.core_type = #tpu.core_type<tc>, window_params = [{transform_indices = @transform_0, window_bounds = array<i64: 384, 256>}, {transform_indices = @transform_1, window_bounds = array<i64: 384, 256>}, {pipeline_mode = #tpu.pipeline_mode<synchronous>, transform_indices = @transform_2, window_bounds = array<i64: 1, 256>}, {pipeline_mode = #tpu.pipeline_mode<synchronous>, transform_indices = @transform_3, window_bounds = array<i64: 1, 256>}, {transform_indices = @transform_4, window_bounds = array<i64: 384, 256>}]} {
    %c0 = arith.constant 0 : index
    %c0_0 = arith.constant 0 : index
    %0 = vector.load %arg1[%c0, %c0_0] : memref<384x256xf32, #tpu.memory_space<vmem>>, vector<384x256xf32>
    %c0_1 = arith.constant 0 : index
    %c0_2 = arith.constant 0 : index
    %1 = vector.load %arg2[%c0_1, %c0_2] : memref<384x256xf32, #tpu.memory_space<vmem>>, vector<384x256xf32>
    %2 = arith.addf %0, %1 : vector<384x256xf32>
    %cst = arith.constant dense<0.000000e+00> : vector<384xf32>
    %3 = vector.multi_reduction <add>, %2, %cst [1] : vector<384x256xf32> to vector<384xf32>
    %4 = vector.shape_cast %3 : vector<384xf32> to vector<384x1xf32>
    %cst_3 = arith.constant 3.906250e-03 : f32
    %5 = vector.broadcast %cst_3 : f32 to vector<384x1xf32>
    %6 = arith.mulf %4, %5 : vector<384x1xf32>
    %7 = vector.broadcast %6 : vector<384x1xf32> to vector<384x256xf32>
    %8 = arith.subf %2, %7 : vector<384x256xf32>
    %9 = arith.mulf %8, %8 : vector<384x256xf32>
    %cst_4 = arith.constant dense<0.000000e+00> : vector<384xf32>
    %10 = vector.multi_reduction <add>, %9, %cst_4 [1] : vector<384x256xf32> to vector<384xf32>
    %11 = vector.shape_cast %10 : vector<384xf32> to vector<384x1xf32>
    %cst_5 = arith.constant 3.906250e-03 : f32
    %12 = vector.broadcast %cst_5 : f32 to vector<384x1xf32>
    %13 = arith.mulf %11, %12 : vector<384x1xf32>
    %cst_6 = arith.constant 9.99999996E-13 : f32
    %14 = vector.broadcast %cst_6 : f32 to vector<384x1xf32>
    %15 = arith.addf %13, %14 : vector<384x1xf32>
    %16 = math.rsqrt %15 : vector<384x1xf32>
    %c0_7 = arith.constant 0 : index
    %c0_8 = arith.constant 0 : index
    %17 = vector.load %arg3[%c0_7, %c0_8] : memref<1x256xf32, #tpu.memory_space<vmem>>, vector<1x256xf32>
    %c0_9 = arith.constant 0 : index
    %c0_10 = arith.constant 0 : index
    %18 = vector.load %arg4[%c0_9, %c0_10] : memref<1x256xf32, #tpu.memory_space<vmem>>, vector<1x256xf32>
    %19 = vector.broadcast %16 : vector<384x1xf32> to vector<384x256xf32>
    %20 = arith.mulf %8, %19 : vector<384x256xf32>
    %21 = vector.broadcast %17 : vector<1x256xf32> to vector<384x256xf32>
    %22 = arith.mulf %20, %21 : vector<384x256xf32>
    %23 = vector.broadcast %18 : vector<1x256xf32> to vector<384x256xf32>
    %24 = arith.addf %22, %23 : vector<384x256xf32>
    %c0_11 = arith.constant 0 : index
    %c0_12 = arith.constant 0 : index
    %25 = vector.load %arg5[%c0_11, %c0_12] : memref<384x256xf32, #tpu.memory_space<vmem>>, vector<384x256xf32>
    tpu.vector_store %arg5[%c0_11, %c0_12], %24 {strides = array<i32>} : memref<384x256xf32, #tpu.memory_space<vmem>>, vector<384x256xf32>,
    return
  }
  func.func @transform_0(%arg0: i32) -> (i32, i32) {
    %c0_i32 = arith.constant 0 : i32
    %c0_i32_0 = arith.constant 0 : i32
    return %arg0, %c0_i32 : i32, i32
  }
  func.func @transform_1(%arg0: i32) -> (i32, i32) {
    %c0_i32 = arith.constant 0 : i32
    %c0_i32_0 = arith.constant 0 : i32
    return %arg0, %c0_i32 : i32, i32
  }
  func.func @transform_2(%arg0: i32) -> (i32, i32) {
    %c0_i32 = arith.constant 0 : i32
    %c0_i32_0 = arith.constant 0 : i32
    %c0_i32_1 = arith.constant 0 : i32
    return %c0_i32, %c0_i32_0 : i32, i32
  }
  func.func @transform_3(%arg0: i32) -> (i32, i32) {
    %c0_i32 = arith.constant 0 : i32
    %c0_i32_0 = arith.constant 0 : i32
    %c0_i32_1 = arith.constant 0 : i32
    return %c0_i32, %c0_i32_0 : i32, i32
  }
  func.func @transform_4(%arg0: i32) -> (i32, i32) {
    %c0_i32 = arith.constant 0 : i32
    %c0_i32_0 = arith.constant 0 : i32
    return %arg0, %c0_i32 : i32, i32
  }
}

</mosaic_0001>

<bundles_post_ra>
// kernel: _add_layernorm_2d.1
= control target key start
LH: loop header
LB: loop body
LE: loop exit
PB: predicated region body
PF: predicated region fallthrough
CT: control target
= control target key end

     0   :  { %9 = vsyncpa [#allocation3], 0  ;;  %s2771_s0 = inlined_call_operand.hbm [shape: f32[384,256], index: 0, kind: input, shape index: {}]   ;;  %s2772_s1 = inlined_call_operand.hbm [shape: f32[384,256], index: 1, kind: input, shape index: {}]   ;;  %s2773_s2 = inlined_call_operand.vmem [shape: f32[1,256], index: 2, kind: input, shape index: {}]   ;;  %s2774_s3 = inlined_call_operand.vmem [shape: f32[1,256], index: 3, kind: input, shape index: {}]   ;;  %s2775_s4 = inlined_call_operand.hbm [shape: f32[384,256], index: 4, kind: output, shape index: {}]  }
   0x1   :  { %10 = vsyncpa [#allocation6], 0 }
   0x2   :  { %11 = vsyncpa [#allocation4], 0  ;;  %s1605_s15 = smov [#allocation2]   ;;  %s1533_s19 = scalar_lea.hbm %s2771_s0, 12288 }
   0x3   :  { %s17_s16 = sshll.u32 %s1605_s15, 4  ;;  %p1534_p0 = scmp.ne.s32.totalorder %s2771_s0, %s1533_s19  ;;  %s18_s16 = int_to_ptr.vmem [resolvable:$true] %s17_s16 }
   0x4   :  { %p1537_p1 = scmp.lt.u32.totalorder %s1533_s19, %s2771_s0 }
   0x6   :  { %p1539_p2 = pnand %p1537_p1, %p1534_p0 }
   0x8   :  { %1542 = shalt.err (!%p1539_p2)
}
   0x9   :  { %s1543_s24 = scalar_lea.vmem %s18_s16, 12288  ;;  %p1548_p4 = scmp.lt.s32.totalorder %s18_s16, %s18_s16 }
   0xa   :  { %p1544_p3 = scmp.ne.s32.totalorder %s18_s16, %s1543_s24  ;;  %p1549_p5 = scmp.lt.s32.totalorder %s1543_s24, %s1543_s24 }
   0xc   :  { %p1550_p6 = por %p1549_p5, %p1548_p4 }
   0xe   :  { %p1551_p7 = pnand %p1550_p6, %p1544_p3 }
  0x10   :  { %1554 = shalt.err (!%p1551_p7)
}
  0x11   :  { %s1606_s25 = smov 256   ;;  %s1607_s26 = smov 16  }
  0x12   :  { %23 = dma.hbm_to_vmem [thread:$0]  %s2771_s0, 12288, %s18_s16, [#allocation3], %s1606_s25, %s1606_s25, %s1607_s26  }
  0x13   :  { %s1608_s29 = smov [#allocation5]   ;;  %s1555_s7 = scalar_lea.hbm %s2772_s1, 12288 }
  0x14   :  { %s29_s30 = sshll.u32 %s1608_s29, 4  ;;  %p1556_p8 = scmp.ne.s32.totalorder %s2772_s1, %s1555_s7  ;;  %s30_s30 = int_to_ptr.vmem [resolvable:$true] %s29_s30 }
  0x15   :  { %p1559_p9 = scmp.lt.u32.totalorder %s1555_s7, %s2772_s1 }
  0x17   :  { %p1561_p10 = pnand %p1559_p9, %p1556_p8 }
  0x19   :  { %1564 = shalt.err (!%p1561_p10)
}
  0x1a   :  { %s1565_s12 = scalar_lea.vmem %s30_s30, 12288  ;;  %p1570_p12 = scmp.lt.s32.totalorder %s30_s30, %s30_s30 }
  0x1b   :  { %p1566_p11 = scmp.ne.s32.totalorder %s30_s30, %s1565_s12  ;;  %p1571_p13 = scmp.lt.s32.totalorder %s1565_s12, %s1565_s12 }
  0x1d   :  { %p1572_p0 = por %p1571_p13, %p1570_p12 }
  0x1f   :  { %p1573_p1 = pnand %p1572_p0, %p1566_p11 }
  0x21   :  { %1576 = shalt.err (!%p1573_p1)
}
  0x22   :  { %35 = dma.hbm_to_vmem [thread:$0]  %s2772_s1, 12288, %s30_s30, [#allocation6], %s1606_s25, %s1606_s25, %s1607_s26  }
  0x23   :  { %1599 = dma.done.wait [#allocation3], 12288  }
  0x24   :  { %1600 = vsyncadd [#allocation3], 4294955008 }
  0x25   :  { %1601 = dma.done.wait [#allocation6], 12288  }
  0x26   :  { %1602 = vsyncadd [#allocation6], 4294955008  ;;  %v46_v0 = vld [vmem:[#allocation2] sm:$0xff]  ;;  %v47_v1 = vld [vmem:[#allocation2 + $0x8] sm:$0xff] }
  0x27   :  { %v142_v2 = vld [vmem:[#allocation5] sm:$0xff]  ;;  %v143_v3 = vld [vmem:[#allocation5 + $0x8] sm:$0xff]  ;;  %v48_v10 = vld [vmem:[#allocation2 + $0x10] sm:$0xff] }
  0x28   :  { %v1665_v4 = vadd.f32 %v142_v2, %v46_v0  ;;  %v50_v5 = vld [vmem:[#allocation2 + $0x20] sm:$0xff]  ;;  %v51_v6 = vld [vmem:[#allocation2 + $0x28] sm:$0xff]  ;;  %v1667_v7 = vadd.f32 %v143_v3, %v47_v1  ;;  %v49_v13 = vld [vmem:[#allocation2 + $0x18] sm:$0xff] }
  0x29   :  { %v146_v8 = vld [vmem:[#allocation5 + $0x20] sm:$0xff]  ;;  %v147_v9 = vld [vmem:[#allocation5 + $0x28] sm:$0xff]  ;;  %v144_v14 = vld [vmem:[#allocation5 + $0x10] sm:$0xff] }
  0x2a   :  { %v1669_v11 = vadd.f32 %v146_v8, %v50_v5  ;;  %v1671_v12 = vadd.f32 %v147_v9, %v51_v6  ;;  %v145_v15 = vld [vmem:[#allocation5 + $0x18] sm:$0xff]  ;;  %v334_v16 = vadd.f32 %v1667_v7, %v1665_v4  ;;  %v1675_v17 = vadd.f32 %v144_v14, %v48_v10  ;;  %v52_v19 = vld [vmem:[#allocation2 + $0x30] sm:$0xff]  ;;  %v54_v25 = vld [vmem:[#allocation2 + $0x40] sm:$0xff] }
  0x2b   :  { %v1677_v18 = vadd.f32 %v145_v15, %v49_v13  ;;  %v53_v20 = vld [vmem:[#allocation2 + $0x38] sm:$0xff]  ;;  %v148_v21 = vld [vmem:[#allocation5 + $0x30] sm:$0xff]  ;;  %v55_v26 = vld [vmem:[#allocation2 + $0x48] sm:$0xff] }
  0x2c   :  { %v340_v22 = vadd.f32 %v1671_v12, %v1669_v11  ;;  %v149_v23 = vld [vmem:[#allocation5 + $0x38] sm:$0xff]  ;;  %v1681_v24 = vadd.f32 %v148_v21, %v52_v19  ;;  %335 = vadd.xlane.f32.xlu0 %v334_v16  ;;  %v150_v29 = vld [vmem:[#allocation5 + $0x40] sm:$0xff]  ;;  %v151_v30 = vld [vmem:[#allocation5 + $0x48] sm:$0xff] }
  0x2d   :  { %v337_v27 = vadd.f32 %v1677_v18, %v1675_v17  ;;  %v1685_v28 = vadd.f32 %v149_v23, %v53_v20  ;;  %v56_v31 = vld [vmem:[#allocation2 + $0x50] sm:$0xff]  ;;  %v1687_v32 = vadd.f32 %v150_v29, %v54_v25  ;;  %v1689_v33 = vadd.f32 %v151_v30, %v55_v26  ;;  %v57_v34 = vld [vmem:[#allocation2 + $0x58] sm:$0xff]  ;;  %v58_v40 = vld [vmem:[#allocation2 + $0x60] sm:$0xff] }
  0x2e   :  { %341 = vadd.xlane.f32.xlu1 %v340_v22  ;;  %v152_v35 = vld [vmem:[#allocation5 + $0x50] sm:$0xff]  ;;  %v153_v36 = vld [vmem:[#allocation5 + $0x58] sm:$0xff]  ;;  %v59_v41 = vld [vmem:[#allocation2 + $0x68] sm:$0xff] }
  0x2f   :  { %v343_v37 = vadd.f32 %v1685_v28, %v1681_v24  ;;  %v1693_v38 = vadd.f32 %v152_v35, %v56_v31  ;;  %v1695_v39 = vadd.f32 %v153_v36, %v57_v34  ;;  %v154_v42 = vld [vmem:[#allocation5 + $0x60] sm:$0xff]  ;;  %v155_v43 = vld [vmem:[#allocation5 + $0x68] sm:$0xff]  ;;  %v60_v44 = vld [vmem:[#allocation2 + $0x70] sm:$0xff]  ;;  %v346_v46 = vadd.f32 %v1689_v33, %v1687_v32 }
  0x30   :  { %v61_v45 = vld [vmem:[#allocation2 + $0x78] sm:$0xff]  ;;  %338 = vadd.xlane.f32.xlu0 %v337_v27  ;;  %v1699_v47 = vadd.f32 %v154_v42, %v58_v40  ;;  %v1701_v48 = vadd.f32 %v155_v43, %v59_v41  ;;  %v156_v49 = vld [vmem:[#allocation5 + $0x70] sm:$0xff]  ;;  %v62_v51 = vld [vmem:[#allocation2 + $0x80] sm:$0xff] }
  0x31   :  { %v157_v50 = vld [vmem:[#allocation5 + $0x78] sm:$0xff]  ;;  %v349_v52 = vadd.f32 %v1695_v39, %v1693_v38  ;;  %v1705_v53 = vadd.f32 %v156_v49, %v60_v44  ;;  %v63_v55 = vld [vmem:[#allocation2 + $0x88] sm:$0xff]  ;;  %v158_v56 = vld [vmem:[#allocation5 + $0x80] sm:$0xff] }
  0x32   :  { %344 = vadd.xlane.f32.xlu1 %v343_v37  ;;  %v1707_v54 = vadd.f32 %v157_v50, %v61_v45  ;;  %v159_v57 = vld [vmem:[#allocation5 + $0x88] sm:$0xff]  ;;  %v64_v58 = vld [vmem:[#allocation2 + $0x90] sm:$0xff]  ;;  %v65_v59 = vld [vmem:[#allocation2 + $0x98] sm:$0xff]  ;;  %v352_v62 = vadd.f32 %v1701_v48, %v1699_v47  ;;  %v1711_v63 = vadd.f32 %v158_v56, %v62_v51 }
  0x33   :  { %v160_v60 = vld [vmem:[#allocation5 + $0x90] sm:$0xff]  ;;  %v161_v61 = vld [vmem:[#allocation5 + $0x98] sm:$0xff]  ;;  %v1713_v0 = vadd.f32 %v159_v57, %v63_v55  ;;  %v66_v1 = vld [vmem:[#allocation2 + $0xa0] sm:$0xff] }
  0x34   :  { %347 = vadd.xlane.f32.xlu0 %v346_v46  ;;  %v67_v2 = vld [vmem:[#allocation2 + $0xa8] sm:$0xff]  ;;  %v355_v3 = vadd.f32 %v1707_v54, %v1705_v53  ;;  %v1717_v5 = vadd.f32 %v160_v60, %v64_v58  ;;  %v1719_v6 = vadd.f32 %v161_v61, %v65_v59  ;;  %v162_v8 = vld [vmem:[#allocation5 + $0xa0] sm:$0xff]  ;;  %v68_v10 = vld [vmem:[#allocation2 + $0xb0] sm:$0xff] }
  0x35   :  { %v163_v9 = vld [vmem:[#allocation5 + $0xa8] sm:$0xff]  ;;  %v69_v13 = vld [vmem:[#allocation2 + $0xb8] sm:$0xff]  ;;  %v164_v14 = vld [vmem:[#allocation5 + $0xb0] sm:$0xff]  ;;  %v358_v16 = vadd.f32 %v1713_v0, %v1711_v63  ;;  %v1723_v19 = vadd.f32 %v162_v8, %v66_v1 }
  0x36   :  { %350 = vadd.xlane.f32.xlu1 %v349_v52  ;;  %v165_v15 = vld [vmem:[#allocation5 + $0xb8] sm:$0xff]  ;;  %v1725_v20 = vadd.f32 %v163_v9, %v67_v2  ;;  %v70_v21 = vld [vmem:[#allocation2 + $0xc0] sm:$0xff]  ;;  %v71_v22 = vld [vmem:[#allocation2 + $0xc8] sm:$0xff]  ;;  %v361_v23 = vadd.f32 %v1719_v6, %v1717_v5  ;;  %v1729_v25 = vadd.f32 %v164_v14, %v68_v10 }
  0x37   :  { %v1731_v26 = vadd.f32 %v165_v15, %v69_v13  ;;  %v166_v27 = vld [vmem:[#allocation5 + $0xc0] sm:$0xff]  ;;  %v167_v29 = vld [vmem:[#allocation5 + $0xc8] sm:$0xff]  ;;  %v72_v30 = vld [vmem:[#allocation2 + $0xd0] sm:$0xff] }
  0x38   :  { %353 = vadd.xlane.f32.xlu0 %v352_v62  ;;  %v73_v31 = vld [vmem:[#allocation2 + $0xd8] sm:$0xff]  ;;  %v168_v34 = vld [vmem:[#allocation5 + $0xd0] sm:$0xff]  ;;  %v364_v36 = vadd.f32 %v1725_v20, %v1723_v19  ;;  %v1735_v37 = vadd.f32 %v166_v27, %v70_v21  ;;  %v1737_v40 = vadd.f32 %v167_v29, %v71_v22  ;;  %v74_v41 = vld [vmem:[#allocation2 + $0xe0] sm:$0xff] }
  0x39   :  { %v169_v35 = vld [vmem:[#allocation5 + $0xd8] sm:$0xff]  ;;  %v75_v42 = vld [vmem:[#allocation2 + $0xe8] sm:$0xff]  ;;  %v367_v43 = vadd.f32 %v1731_v26, %v1729_v25  ;;  %v1741_v44 = vadd.f32 %v168_v34, %v72_v30  ;;  %v170_v46 = vld [vmem:[#allocation5 + $0xe0] sm:$0xff] }
  0x3a   :  { %356 = vadd.xlane.f32.xlu1 %v355_v3  ;;  %v1743_v45 = vadd.f32 %v169_v35, %v73_v31  ;;  %v171_v49 = vld [vmem:[#allocation5 + $0xe8] sm:$0xff]  ;;  %v76_v50 = vld [vmem:[#allocation2 + $0xf0] sm:$0xff]  ;;  %v77_v51 = vld [vmem:[#allocation2 + $0xf8] sm:$0xff]  ;;  %v370_v56 = vadd.f32 %v1737_v40, %v1735_v37  ;;  %v1747_v57 = vadd.f32 %v170_v46, %v74_v41 }
  0x3b   :  { %v172_v52 = vld [vmem:[#allocation5 + $0xf0] sm:$0xff]  ;;  %v173_v55 = vld [vmem:[#allocation5 + $0xf8] sm:$0xff]  ;;  %v1749_v58 = vadd.f32 %v171_v49, %v75_v42  ;;  %v78_v59 = vld [vmem:[#allocation2 + $0x100] sm:$0xff] }
  0x3c   :  { %359 = vadd.xlane.f32.xlu0 %v358_v16  ;;  %v79_v60 = vld [vmem:[#allocation2 + $0x108] sm:$0xff]  ;;  %v373_v61 = vadd.f32 %v1743_v45, %v1741_v44  ;;  %v1753_v62 = vadd.f32 %v172_v52, %v76_v50  ;;  %v1755_v1 = vadd.f32 %v173_v55, %v77_v51  ;;  %v174_v2 = vld [vmem:[#allocation5 + $0x100] sm:$0xff]  ;;  %v80_v8 = vld [vmem:[#allocation2 + $0x110] sm:$0xff] }
  0x3d   :  { %v175_v3 = vld [vmem:[#allocation5 + $0x108] sm:$0xff]  ;;  %v81_v9 = vld [vmem:[#allocation2 + $0x118] sm:$0xff]  ;;  %v176_v10 = vld [vmem:[#allocation5 + $0x110] sm:$0xff]  ;;  %v376_v14 = vadd.f32 %v1749_v58, %v1747_v57  ;;  %v1759_v15 = vadd.f32 %v174_v2, %v78_v59 }
  0x3e   :  { %362 = vadd.xlane.f32.xlu1 %v361_v23  ;;  %v177_v13 = vld [vmem:[#allocation5 + $0x118] sm:$0xff]  ;;  %v1761_v16 = vadd.f32 %v175_v3, %v79_v60  ;;  %v82_v21 = vld [vmem:[#allocation2 + $0x120] sm:$0xff]  ;;  %v83_v22 = vld [vmem:[#allocation2 + $0x128] sm:$0xff]  ;;  %v379_v23 = vadd.f32 %v1755_v1, %v1753_v62  ;;  %v1765_v27 = vadd.f32 %v176_v10, %v80_v8 }
  0x3f   :  { %v1767_v29 = vadd.f32 %v177_v13, %v81_v9  ;;  %v178_v30 = vld [vmem:[#allocation5 + $0x120] sm:$0xff]  ;;  %v179_v31 = vld [vmem:[#allocation5 + $0x128] sm:$0xff]  ;;  %v84_v34 = vld [vmem:[#allocation2 + $0x130] sm:$0xff] }
  0x40   :  { %365 = vadd.xlane.f32.xlu0 %v364_v36  ;;  %v85_v35 = vld [vmem:[#allocation2 + $0x138] sm:$0xff]  ;;  %v180_v36 = vld [vmem:[#allocation5 + $0x130] sm:$0xff]  ;;  %v382_v42 = vadd.f32 %v1761_v16, %v1759_v15  ;;  %v1773_v46 = vadd.f32 %v179_v31, %v83_v22  ;;  %v86_v49 = vld [vmem:[#allocation2 + $0x140] sm:$0xff] }
  0x41   :  { %v181_v41 = vld [vmem:[#allocation5 + $0x138] sm:$0xff]  ;;  %v87_v50 = vld [vmem:[#allocation2 + $0x148] sm:$0xff]  ;;  %v385_v51 = vadd.f32 %v1767_v29, %v1765_v27  ;;  %v1777_v52 = vadd.f32 %v180_v36, %v84_v34  ;;  %v88_v60 = vld [vmem:[#allocation2 + $0x150] sm:$0xff] }
  0x42   :  { %368 = vadd.xlane.f32.xlu1 %v367_v43  ;;  %v1771_v43 = vadd.f32 %v178_v30, %v82_v21  ;;  %v1779_v55 = vadd.f32 %v181_v41, %v85_v35  ;;  %v183_v59 = vld [vmem:[#allocation5 + $0x148] sm:$0xff]  ;;  %v184_v2 = vld [vmem:[#allocation5 + $0x150] sm:$0xff]  ;;  %v185_v3 = vld [vmem:[#allocation5 + $0x158] sm:$0xff] }
  0x43   :  { %2876 = vst [vmem:[#allocation11_spill] sm:$0xff] %v1777_v52  ;;  %v1785_v10 = vadd.f32 %v183_v59, %v87_v50  ;;  %v90_v13 = vld [vmem:[#allocation2 + $0x160] sm:$0xff]  ;;  %v1789_v22 = vadd.f32 %v184_v2, %v88_v60  ;;  %v187_v31 = vld [vmem:[#allocation5 + $0x168] sm:$0xff]  ;;  %v92_v34 = vld [vmem:[#allocation2 + $0x170] sm:$0xff] }
  0x44   :  { %371 = vadd.xlane.f32.xlu0 %v370_v56  ;;  %2877 = vst [vmem:[#allocation12_spill] sm:$0xff] %v1779_v55  ;;  %v182_v56 = vld [vmem:[#allocation5 + $0x140] sm:$0xff]  ;;  %v388_v8 = vadd.f32 %v1773_v46, %v1771_v43  ;;  %v391_v21 = vadd.f32 %v1779_v55, %v1777_v52  ;;  %v93_v35 = vld [vmem:[#allocation2 + $0x178] sm:$0xff]  ;;  %v188_v36 = vld [vmem:[#allocation5 + $0x170] sm:$0xff] }
  0x45   :  { %v1783_v9 = vadd.f32 %v182_v56, %v86_v49  ;;  %2879 = vst [vmem:[#allocation14_spill] sm:$0xff] %v1785_v10  ;;  %2880 = vst [vmem:[#allocation15_spill] sm:$0xff] %v1789_v22  ;;  %v186_v30 = vld [vmem:[#allocation5 + $0x160] sm:$0xff]  ;;  %v189_v41 = vld [vmem:[#allocation5 + $0x178] sm:$0xff]  ;;  %v1801_v60 = vadd.f32 %v188_v36, %v92_v34 }
  0x46   :  { %374 = vadd.xlane.f32.xlu1 %v373_v61  ;;  %v89_v61 = vld [vmem:[#allocation2 + $0x158] sm:$0xff]  ;;  %v1795_v49 = vadd.f32 %v186_v30, %v90_v13  ;;  %v95_v56 = vld [vmem:[#allocation2 + $0x188] sm:$0xff]  ;;  %v190_v2 = vld [vmem:[#allocation5 + $0x180] sm:$0xff] }
  0x47   :  { %2878 = vst [vmem:[#allocation13_spill] sm:$0xff] %v1783_v9  ;;  %2884 = vst [vmem:[#allocation19_spill] sm:$0xff] %v1801_v60  ;;  %v97_v55 = vld [vmem:[#allocation2 + $0x198] sm:$0xff]  ;;  %v192_v52 = vld [vmem:[#allocation5 + $0x190] sm:$0xff] }
  0x48   :  { %377 = vadd.xlane.f32.xlu0 %v376_v14  ;;  %v91_v14 = vld [vmem:[#allocation2 + $0x168] sm:$0xff]  ;;  %2882 = vst [vmem:[#allocation17_spill] sm:$0xff] %v1795_v49  ;;  %v98_v30 = vld [vmem:[#allocation2 + $0x1a0] sm:$0xff] }
  0x49   :  { %v1797_v50 = vadd.f32 %v187_v31, %v91_v14  ;;  %v99_v31 = vld [vmem:[#allocation2 + $0x1a8] sm:$0xff] }
  0x4a   :  { %380 = vadd.xlane.f32.xlu1 %v379_v23  ;;  %v1791_v23 = vadd.f32 %v185_v3, %v89_v61  ;;  %v1803_v61 = vadd.f32 %v189_v41, %v93_v35  ;;  %v191_v3 = vld [vmem:[#allocation5 + $0x188] sm:$0xff]  ;;  %v194_v41 = vld [vmem:[#allocation5 + $0x1a0] sm:$0xff] }
  0x4b   :  { %2883 = vst [vmem:[#allocation18_spill] sm:$0xff] %v1797_v50  ;;  %v400_v13 = vadd.f32 %v1797_v50, %v1795_v49  ;;  %v197_v50 = vld [vmem:[#allocation5 + $0x1b8] sm:$0xff]  ;;  %v200_v49 = vld [vmem:[#allocation5 + $0x1d0] sm:$0xff] }
  0x4c   :  { %383 = vadd.xlane.f32.xlu0 %v382_v42  ;;  %2881 = vst [vmem:[#allocation16_spill] sm:$0xff] %v1791_v23  ;;  %v394_v42 = vadd.f32 %v1785_v10, %v1783_v9  ;;  %v397_v59 = vadd.f32 %v1791_v23, %v1789_v22  ;;  %2885 = vst [vmem:[#allocation20_spill] sm:$0xff] %v1803_v61  ;;  %v193_v10 = vld [vmem:[#allocation5 + $0x198] sm:$0xff]  ;;  %v403_v34 = vadd.f32 %v1803_v61, %v1801_v60  ;;  %v195_v23 = vld [vmem:[#allocation5 + $0x1a8] sm:$0xff] }
  0x4d   :  { %v1815_v36 = vadd.f32 %v193_v10, %v97_v55  ;;  %v101_v22 = vld [vmem:[#allocation2 + $0x1b8] sm:$0xff]  ;;  %v196_v9 = vld [vmem:[#allocation5 + $0x1b0] sm:$0xff]  ;;  %v199_v61 = vld [vmem:[#allocation5 + $0x1c8] sm:$0xff] }
  0x4e   :  { %386 = vadd.xlane.f32.xlu1 %v385_v51  ;;  %v94_v51 = vld [vmem:[#allocation2 + $0x180] sm:$0xff]  ;;  %v1827_v10 = vadd.f32 %v197_v50, %v101_v22  ;;  %v105_v60 = vld [vmem:[#allocation2 + $0x1d8] sm:$0xff] }
  0x4f   :  { %v1807_v14 = vadd.f32 %v190_v2, %v94_v51  ;;  %2889 = vst [vmem:[#allocation24_spill] sm:$0xff] %v1815_v36  ;;  %v102_v2 = vld [vmem:[#allocation2 + $0x1c0] sm:$0xff] }
  0x50   :  { %389 = vadd.xlane.f32.xlu0 %v388_v8  ;;  %v96_v8 = vld [vmem:[#allocation2 + $0x190] sm:$0xff]  ;;  %2893 = vst [vmem:[#allocation28_spill] sm:$0xff] %v1827_v10 }
  0x51   :  { %2886 = vst [vmem:[#allocation21_spill] sm:$0xff] %v1807_v14  ;;  %v1813_v35 = vadd.f32 %v192_v52, %v96_v8  ;;  %v198_v8 = vld [vmem:[#allocation5 + $0x1c0] sm:$0xff] }
  0x52   :  { %392 = vadd.xlane.f32.xlu1 %v391_v21  ;;  %v1809_v21 = vadd.f32 %v191_v3, %v95_v56  ;;  %v1819_v56 = vadd.f32 %v194_v41, %v98_v30  ;;  %v103_v3 = vld [vmem:[#allocation2 + $0x1c8] sm:$0xff]  ;;  %v1831_v30 = vadd.f32 %v198_v8, %v102_v2 }
  0x53   :  { %2888 = vst [vmem:[#allocation23_spill] sm:$0xff] %v1813_v35  ;;  %v409_v52 = vadd.f32 %v1815_v36, %v1813_v35  ;;  %v107_v41 = vld [vmem:[#allocation2 + $0x1e8] sm:$0xff]  ;;  %v109_v35 = vld [vmem:[#allocation2 + $0x1f8] sm:$0xff] }
  0x54   :  { %395 = vadd.xlane.f32.xlu0 %v394_v42  ;;  %2887 = vst [vmem:[#allocation22_spill] sm:$0xff] %v1809_v21  ;;  %v100_v42 = vld [vmem:[#allocation2 + $0x1b0] sm:$0xff]  ;;  %v406_v51 = vadd.f32 %v1809_v21, %v1807_v14  ;;  %2890 = vst [vmem:[#allocation25_spill] sm:$0xff] %v1819_v56  ;;  %v201_v21 = vld [vmem:[#allocation5 + $0x1d8] sm:$0xff] }
  0x55   :  { %v1825_v55 = vadd.f32 %v196_v9, %v100_v42  ;;  %2894 = vst [vmem:[#allocation29_spill] sm:$0xff] %v1831_v30  ;;  %v1839_v50 = vadd.f32 %v201_v21, %v105_v60  ;;  %v202_v42 = vld [vmem:[#allocation5 + $0x1e0] sm:$0xff]  ;;  %v203_v36 = vld [vmem:[#allocation5 + $0x1e8] sm:$0xff]  ;;  %v204_v14 = vld [vmem:[#allocation5 + $0x1f0] sm:$0xff] }
  0x56   :  { %398 = vadd.xlane.f32.xlu1 %v397_v59  ;;  %v1821_v59 = vadd.f32 %v195_v23, %v99_v31  ;;  %v1833_v31 = vadd.f32 %v199_v61, %v103_v3  ;;  %v1845_v3 = vadd.f32 %v203_v36, %v107_v41  ;;  %v111_v8 = vld [vmem:[#allocation2 + $0x208] sm:$0xff] }
  0x57   :  { %2892 = vst [vmem:[#allocation27_spill] sm:$0xff] %v1825_v55  ;;  %v415_v9 = vadd.f32 %v1827_v10, %v1825_v55  ;;  %2897 = vst [vmem:[#allocation32_spill] sm:$0xff] %v1839_v50  ;;  %v207_v10 = vld [vmem:[#allocation5 + $0x208] sm:$0xff]  ;;  %v113_v55 = vld [vmem:[#allocation2 + $0x218] sm:$0xff] }
  0x58   :  { %401 = vadd.xlane.f32.xlu0 %v400_v13  ;;  %2891 = vst [vmem:[#allocation26_spill] sm:$0xff] %v1821_v59  ;;  %v104_v13 = vld [vmem:[#allocation2 + $0x1d0] sm:$0xff]  ;;  %v412_v23 = vadd.f32 %v1821_v59, %v1819_v56  ;;  %2895 = vst [vmem:[#allocation30_spill] sm:$0xff] %v1833_v31  ;;  %v205_v59 = vld [vmem:[#allocation5 + $0x1f8] sm:$0xff]  ;;  %v418_v61 = vadd.f32 %v1833_v31, %v1831_v30  ;;  %v1857_v41 = vadd.f32 %v207_v10, %v111_v8 }
  0x59   :  { %v1837_v22 = vadd.f32 %v200_v49, %v104_v13  ;;  %2899 = vst [vmem:[#allocation34_spill] sm:$0xff] %v1845_v3  ;;  %v1851_v21 = vadd.f32 %v205_v59, %v109_v35  ;;  %v206_v13 = vld [vmem:[#allocation5 + $0x200] sm:$0xff]  ;;  %v208_v56 = vld [vmem:[#allocation5 + $0x210] sm:$0xff]  ;;  %v209_v31 = vld [vmem:[#allocation5 + $0x218] sm:$0xff] }
  0x5a   :  { %404 = vadd.xlane.f32.xlu1 %v403_v34  ;;  %v106_v34 = vld [vmem:[#allocation2 + $0x1e0] sm:$0xff]  ;;  %2903 = vst [vmem:[#allocation38_spill] sm:$0xff] %v1857_v41  ;;  %v1863_v59 = vadd.f32 %v209_v31, %v113_v55  ;;  %v212_v30 = vld [vmem:[#allocation5 + $0x230] sm:$0xff] }
  0x5b   :  { %2896 = vst [vmem:[#allocation31_spill] sm:$0xff] %v1837_v22  ;;  %v1843_v2 = vadd.f32 %v202_v42, %v106_v34  ;;  %v421_v49 = vadd.f32 %v1839_v50, %v1837_v22  ;;  %2901 = vst [vmem:[#allocation36_spill] sm:$0xff] %v1851_v21  ;;  %v115_v42 = vld [vmem:[#allocation2 + $0x228] sm:$0xff]  ;;  %v117_v22 = vld [vmem:[#allocation2 + $0x238] sm:$0xff] }
  0x5c   :  { %407 = vadd.xlane.f32.xlu0 %v406_v51  ;;  %v108_v51 = vld [vmem:[#allocation2 + $0x1f0] sm:$0xff]  ;;  %2905 = vst [vmem:[#allocation40_spill] sm:$0xff] %v1863_v59  ;;  %v211_v50 = vld [vmem:[#allocation5 + $0x228] sm:$0xff] }
  0x5d   :  { %2898 = vst [vmem:[#allocation33_spill] sm:$0xff] %v1843_v2  ;;  %v1849_v60 = vadd.f32 %v204_v14, %v108_v51  ;;  %v424_v36 = vadd.f32 %v1845_v3, %v1843_v2  ;;  %v210_v51 = vld [vmem:[#allocation5 + $0x220] sm:$0xff]  ;;  %v213_v3 = vld [vmem:[#allocation5 + $0x238] sm:$0xff]  ;;  %v1869_v8 = vadd.f32 %v211_v50, %v115_v42  ;;  %v216_v2 = vld [vmem:[#allocation5 + $0x250] sm:$0xff] }
  0x5e   :  { %410 = vadd.xlane.f32.xlu1 %v409_v52  ;;  %v110_v52 = vld [vmem:[#allocation2 + $0x200] sm:$0xff]  ;;  %v1875_v31 = vadd.f32 %v213_v3, %v117_v22 }
  0x5f   :  { %2900 = vst [vmem:[#allocation35_spill] sm:$0xff] %v1849_v60  ;;  %v1855_v34 = vadd.f32 %v206_v13, %v110_v52  ;;  %v427_v14 = vadd.f32 %v1851_v21, %v1849_v60  ;;  %2907 = vst [vmem:[#allocation42_spill] sm:$0xff] %v1869_v8  ;;  %v119_v13 = vld [vmem:[#allocation2 + $0x248] sm:$0xff]  ;;  %v121_v60 = vld [vmem:[#allocation2 + $0x258] sm:$0xff] }
  0x60   :  { %413 = vadd.xlane.f32.xlu0 %v412_v23  ;;  %v112_v23 = vld [vmem:[#allocation2 + $0x210] sm:$0xff]  ;;  %2909 = vst [vmem:[#allocation44_spill] sm:$0xff] %v1875_v31  ;;  %v215_v21 = vld [vmem:[#allocation5 + $0x248] sm:$0xff] }
  0x61   :  { %2902 = vst [vmem:[#allocation37_spill] sm:$0xff] %v1855_v34  ;;  %v1861_v35 = vadd.f32 %v208_v56, %v112_v23  ;;  %v430_v10 = vadd.f32 %v1857_v41, %v1855_v34  ;;  %v214_v23 = vld [vmem:[#allocation5 + $0x240] sm:$0xff]  ;;  %v217_v41 = vld [vmem:[#allocation5 + $0x258] sm:$0xff]  ;;  %v1881_v42 = vadd.f32 %v215_v21, %v119_v13  ;;  %v220_v34 = vld [vmem:[#allocation5 + $0x270] sm:$0xff] }
  0x62   :  { %416 = vadd.xlane.f32.xlu1 %v415_v9  ;;  %v114_v9 = vld [vmem:[#allocation2 + $0x220] sm:$0xff]  ;;  %v1887_v3 = vadd.f32 %v217_v41, %v121_v60 }
  0x63   :  { %2904 = vst [vmem:[#allocation39_spill] sm:$0xff] %v1861_v35  ;;  %v1867_v52 = vadd.f32 %v210_v51, %v114_v9  ;;  %v433_v56 = vadd.f32 %v1863_v59, %v1861_v35  ;;  %2911 = vst [vmem:[#allocation46_spill] sm:$0xff] %v1881_v42  ;;  %v123_v51 = vld [vmem:[#allocation2 + $0x268] sm:$0xff]  ;;  %v125_v35 = vld [vmem:[#allocation2 + $0x278] sm:$0xff] }
  0x64   :  { %419 = vadd.xlane.f32.xlu0 %v418_v61  ;;  %v116_v61 = vld [vmem:[#allocation2 + $0x230] sm:$0xff]  ;;  %2913 = vst [vmem:[#allocation48_spill] sm:$0xff] %v1887_v3  ;;  %v219_v59 = vld [vmem:[#allocation5 + $0x268] sm:$0xff] }
  0x65   :  { %2906 = vst [vmem:[#allocation41_spill] sm:$0xff] %v1867_v52  ;;  %v1873_v55 = vadd.f32 %v212_v30, %v116_v61  ;;  %v436_v50 = vadd.f32 %v1869_v8, %v1867_v52  ;;  %v218_v61 = vld [vmem:[#allocation5 + $0x260] sm:$0xff]  ;;  %v221_v8 = vld [vmem:[#allocation5 + $0x278] sm:$0xff]  ;;  %v1893_v13 = vadd.f32 %v219_v59, %v123_v51  ;;  %v224_v52 = vld [vmem:[#allocation5 + $0x290] sm:$0xff] }
  0x66   :  { %422 = vadd.xlane.f32.xlu1 %v421_v49  ;;  %v118_v49 = vld [vmem:[#allocation2 + $0x240] sm:$0xff]  ;;  %v1899_v41 = vadd.f32 %v221_v8, %v125_v35 }
  0x67   :  { %2908 = vst [vmem:[#allocation43_spill] sm:$0xff] %v1873_v55  ;;  %v1879_v9 = vadd.f32 %v214_v23, %v118_v49  ;;  %v439_v30 = vadd.f32 %v1875_v31, %v1873_v55  ;;  %2915 = vst [vmem:[#allocation50_spill] sm:$0xff] %v1893_v13  ;;  %v127_v23 = vld [vmem:[#allocation2 + $0x288] sm:$0xff]  ;;  %v129_v55 = vld [vmem:[#allocation2 + $0x298] sm:$0xff] }
  0x68   :  { %425 = vadd.xlane.f32.xlu0 %v424_v36  ;;  %v120_v36 = vld [vmem:[#allocation2 + $0x250] sm:$0xff]  ;;  %2917 = vst [vmem:[#allocation52_spill] sm:$0xff] %v1899_v41  ;;  %v223_v31 = vld [vmem:[#allocation5 + $0x288] sm:$0xff] }
  0x69   :  { %2910 = vst [vmem:[#allocation45_spill] sm:$0xff] %v1879_v9  ;;  %v1885_v22 = vadd.f32 %v216_v2, %v120_v36  ;;  %v442_v21 = vadd.f32 %v1881_v42, %v1879_v9  ;;  %v222_v36 = vld [vmem:[#allocation5 + $0x280] sm:$0xff]  ;;  %v225_v42 = vld [vmem:[#allocation5 + $0x298] sm:$0xff]  ;;  %v1905_v51 = vadd.f32 %v223_v31, %v127_v23  ;;  %v228_v9 = vld [vmem:[#allocation5 + $0x2b0] sm:$0xff] }
  0x6a   :  { %428 = vadd.xlane.f32.xlu1 %v427_v14  ;;  %v122_v14 = vld [vmem:[#allocation2 + $0x260] sm:$0xff]  ;;  %v1911_v8 = vadd.f32 %v225_v42, %v129_v55 }
  0x6b   :  { %2912 = vst [vmem:[#allocation47_spill] sm:$0xff] %v1885_v22  ;;  %v1891_v49 = vadd.f32 %v218_v61, %v122_v14  ;;  %v445_v2 = vadd.f32 %v1887_v3, %v1885_v22  ;;  %2919 = vst [vmem:[#allocation54_spill] sm:$0xff] %v1905_v51  ;;  %v131_v61 = vld [vmem:[#allocation2 + $0x2a8] sm:$0xff]  ;;  %v133_v22 = vld [vmem:[#allocation2 + $0x2b8] sm:$0xff] }
  0x6c   :  { %431 = vadd.xlane.f32.xlu0 %v430_v10  ;;  %v124_v10 = vld [vmem:[#allocation2 + $0x270] sm:$0xff]  ;;  %2921 = vst [vmem:[#allocation56_spill] sm:$0xff] %v1911_v8  ;;  %v227_v3 = vld [vmem:[#allocation5 + $0x2a8] sm:$0xff] }
  0x6d   :  { %2914 = vst [vmem:[#allocation49_spill] sm:$0xff] %v1891_v49  ;;  %v1897_v60 = vadd.f32 %v220_v34, %v124_v10  ;;  %v448_v59 = vadd.f32 %v1893_v13, %v1891_v49  ;;  %v226_v10 = vld [vmem:[#allocation5 + $0x2a0] sm:$0xff]  ;;  %v229_v13 = vld [vmem:[#allocation5 + $0x2b8] sm:$0xff]  ;;  %v1917_v23 = vadd.f32 %v227_v3, %v131_v61  ;;  %v232_v49 = vld [vmem:[#allocation5 + $0x2d0] sm:$0xff] }
  0x6e   :  { %434 = vadd.xlane.f32.xlu1 %v433_v56  ;;  %v126_v56 = vld [vmem:[#allocation2 + $0x280] sm:$0xff]  ;;  %v1923_v42 = vadd.f32 %v229_v13, %v133_v22 }
  0x6f   :  { %2916 = vst [vmem:[#allocation51_spill] sm:$0xff] %v1897_v60  ;;  %v1903_v14 = vadd.f32 %v222_v36, %v126_v56  ;;  %v451_v34 = vadd.f32 %v1899_v41, %v1897_v60  ;;  %2922 = vst [vmem:[#allocation57_spill] sm:$0xff] %v1917_v23  ;;  %v135_v36 = vld [vmem:[#allocation2 + $0x2c8] sm:$0xff]  ;;  %v137_v60 = vld [vmem:[#allocation2 + $0x2d8] sm:$0xff] }
  0x70   :  { %437 = vadd.xlane.f32.xlu0 %v436_v50  ;;  %v128_v50 = vld [vmem:[#allocation2 + $0x290] sm:$0xff]  ;;  %v231_v41 = vld [vmem:[#allocation5 + $0x2c8] sm:$0xff] }
  0x71   :  { %2918 = vst [vmem:[#allocation53_spill] sm:$0xff] %v1903_v14  ;;  %v1909_v35 = vadd.f32 %v224_v52, %v128_v50  ;;  %v454_v31 = vadd.f32 %v1905_v51, %v1903_v14  ;;  %v230_v50 = vld [vmem:[#allocation5 + $0x2c0] sm:$0xff]  ;;  %v233_v51 = vld [vmem:[#allocation5 + $0x2d8] sm:$0xff]  ;;  %v1929_v61 = vadd.f32 %v231_v41, %v135_v36  ;;  %v236_v14 = vld [vmem:[#allocation5 + $0x2f0] sm:$0xff] }
  0x72   :  { %440 = vadd.xlane.f32.xlu1 %v439_v30  ;;  %v130_v30 = vld [vmem:[#allocation2 + $0x2a0] sm:$0xff]  ;;  %v1935_v13 = vadd.f32 %v233_v51, %v137_v60 }
  0x73   :  { %2920 = vst [vmem:[#allocation55_spill] sm:$0xff] %v1909_v35  ;;  %v1915_v56 = vadd.f32 %v226_v10, %v130_v30  ;;  %v457_v52 = vadd.f32 %v1911_v8, %v1909_v35  ;;  %v139_v10 = vld [vmem:[#allocation2 + $0x2e8] sm:$0xff]  ;;  %v141_v35 = vld [vmem:[#allocation2 + $0x2f8] sm:$0xff] }
  0x74   :  { %443 = vadd.xlane.f32.xlu0 %v442_v21  ;;  %v132_v21 = vld [vmem:[#allocation2 + $0x2b0] sm:$0xff]  ;;  %v235_v8 = vld [vmem:[#allocation5 + $0x2e8] sm:$0xff] }
  0x75   :  { %v1921_v55 = vadd.f32 %v228_v9, %v132_v21  ;;  %v460_v3 = vadd.f32 %v1917_v23, %v1915_v56  ;;  %v234_v21 = vld [vmem:[#allocation5 + $0x2e0] sm:$0xff]  ;;  %v237_v23 = vld [vmem:[#allocation5 + $0x2f8] sm:$0xff]  ;;  %v1941_v36 = vadd.f32 %v235_v8, %v139_v10 }
  0x76   :  { %446 = vadd.xlane.f32.xlu1 %v445_v2  ;;  %v134_v2 = vld [vmem:[#allocation2 + $0x2c0] sm:$0xff]  ;;  %v1947_v51 = vadd.f32 %v237_v23, %v141_v35 }
  0x77   :  { %v1927_v30 = vadd.f32 %v230_v50, %v134_v2  ;;  %v463_v9 = vadd.f32 %v1923_v42, %v1921_v55 }
  0x78   :  { %449 = vadd.xlane.f32.xlu0 %v448_v59  ;;  %v136_v59 = vld [vmem:[#allocation2 + $0x2d0] sm:$0xff] }
  0x79   :  { %v1933_v22 = vadd.f32 %v232_v49, %v136_v59  ;;  %v466_v41 = vadd.f32 %v1929_v61, %v1927_v30 }
  0x7a   :  { %452 = vadd.xlane.f32.xlu1 %v451_v34  ;;  %v138_v34 = vld [vmem:[#allocation2 + $0x2e0] sm:$0xff] }
  0x7b   :  { %v1939_v2 = vadd.f32 %v234_v21, %v138_v34  ;;  %v469_v49 = vadd.f32 %v1935_v13, %v1933_v22 }
  0x7c   :  { %455 = vadd.xlane.f32.xlu0 %v454_v31  ;;  %v140_v31 = vld [vmem:[#allocation2 + $0x2f0] sm:$0xff] }
  0x7d   :  { %v1945_v60 = vadd.f32 %v236_v14, %v140_v31 }
  0x7e   :  { %458 = vadd.xlane.f32.xlu1 %v457_v52  ;;  %v472_v52 = vadd.f32 %v1941_v36, %v1939_v2 }
  0x7f   :  { %v475_v50 = vadd.f32 %v1947_v51, %v1945_v60 }
  0x80   :  { %461 = vadd.xlane.f32.xlu0 %v460_v3 }
  0x82   :  { %464 = vadd.xlane.f32.xlu1 %v463_v9 }
  0x84   :  { %467 = vadd.xlane.f32.xlu0 %v466_v41 }
  0x86   :  { %470 = vadd.xlane.f32.xlu1 %v469_v49 }
  0x88   :  { %473 = vadd.xlane.f32.xlu0 %v472_v52 }
  0x8a   :  { %476 = vadd.xlane.f32.xlu1 %v475_v50 }
  0xb9   :  { %v336_v8 = vpop.xlane.xlu0 %335 }
  0xba   :  { %v478_v59 = vmul.f32 0.00390625, %v336_v8 }
  0xbb   :  { %v342_v3 = vpop.xlane.xlu1 %341 }
  0xbc   :  { %v480_v34 = vmul.f32 0.00390625, %v342_v3  ;;  %v1954_v10 = vsub.f32 %v1665_v4, %v478_v59  ;;  %v1957_v14 = vsub.f32 %v1667_v7, %v478_v59 }
  0xbd   :  { %v339_v9 = vpop.xlane.xlu0 %338 }
  0xbe   :  { %v1960_v35 = vsub.f32 %v1669_v11, %v480_v34  ;;  %v1963_v23 = vsub.f32 %v1671_v12, %v480_v34  ;;  %v479_v21 = vmul.f32 0.00390625, %v339_v9  ;;  %v622_v41 = vmul.f32 %v1954_v10, %v1954_v10 }
  0xbf   :  { %v345_v31 = vpop.xlane.xlu1 %344  ;;  %v623_v49 = vmul.f32 %v1957_v14, %v1957_v14 }
  0xc0   :  { %2923 = vst [vmem:[#allocation58_spill] sm:$0xff] %v1963_v23  ;;  %v481_v4 = vmul.f32 0.00390625, %v345_v31  ;;  %v626_v7 = vmul.f32 %v1960_v35, %v1960_v35  ;;  %v627_v11 = vmul.f32 %v1963_v23, %v1963_v23  ;;  %v1974_v52 = vsub.f32 %v1675_v17, %v479_v21 }
  0xc1   :  { %v1977_v12 = vsub.f32 %v1677_v18, %v479_v21  ;;  %v718_v50 = vadd.f32 %v623_v49, %v622_v41  ;;  %v348_v3 = vpop.xlane.xlu0 %347 }
  0xc2   :  { %v1980_v8 = vsub.f32 %v1681_v24, %v481_v4  ;;  %v1983_v59 = vsub.f32 %v1685_v28, %v481_v4  ;;  %v482_v34 = vmul.f32 0.00390625, %v348_v3  ;;  %v724_v31 = vadd.f32 %v627_v11, %v626_v7 }
  0xc3   :  { %719 = vadd.xlane.f32.xlu0 %v718_v50  ;;  %v351_v9 = vpop.xlane.xlu1 %350  ;;  %v624_v23 = vmul.f32 %v1974_v52, %v1974_v52  ;;  %v625_v17 = vmul.f32 %v1977_v12, %v1977_v12 }
  0xc4   :  { %v483_v18 = vmul.f32 0.00390625, %v351_v9  ;;  %v628_v21 = vmul.f32 %v1980_v8, %v1980_v8  ;;  %v629_v24 = vmul.f32 %v1983_v59, %v1983_v59  ;;  %v1994_v28 = vsub.f32 %v1687_v32, %v482_v34 }
  0xc5   :  { %v1997_v41 = vsub.f32 %v1689_v33, %v482_v34  ;;  %v721_v49 = vadd.f32 %v625_v17, %v624_v23  ;;  %v354_v11 = vpop.xlane.xlu0 %353 }
  0xc6   :  { %v2000_v4 = vsub.f32 %v1693_v38, %v483_v18  ;;  %v2003_v7 = vsub.f32 %v1695_v39, %v483_v18  ;;  %v484_v50 = vmul.f32 0.00390625, %v354_v11  ;;  %v727_v9 = vadd.f32 %v629_v24, %v628_v21 }
  0xc7   :  { %725 = vadd.xlane.f32.xlu0 %v724_v31  ;;  %722 = vadd.xlane.f32.xlu1 %v721_v49  ;;  %v357_v3 = vpop.xlane.xlu1 %356  ;;  %v630_v32 = vmul.f32 %v1994_v28, %v1994_v28  ;;  %v631_v33 = vmul.f32 %v1997_v41, %v1997_v41 }
  0xc8   :  { %v485_v34 = vmul.f32 0.00390625, %v357_v3  ;;  %v632_v38 = vmul.f32 %v2000_v4, %v2000_v4  ;;  %v633_v39 = vmul.f32 %v2003_v7, %v2003_v7  ;;  %v2014_v23 = vsub.f32 %v1699_v47, %v484_v50 }
  0xc9   :  { %v2017_v31 = vsub.f32 %v1701_v48, %v484_v50  ;;  %v730_v17 = vadd.f32 %v631_v33, %v630_v32  ;;  %v360_v24 = vpop.xlane.xlu0 %359 }
  0xca   :  { %v2020_v18 = vsub.f32 %v1705_v53, %v485_v34  ;;  %v2023_v21 = vsub.f32 %v1707_v54, %v485_v34  ;;  %v486_v49 = vmul.f32 0.00390625, %v360_v24  ;;  %v733_v3 = vadd.f32 %v633_v39, %v632_v38 }
  0xcb   :  { %728 = vadd.xlane.f32.xlu1 %v727_v9  ;;  %731 = vadd.xlane.f32.xlu0 %v730_v17  ;;  %v363_v11 = vpop.xlane.xlu1 %362  ;;  %v634_v47 = vmul.f32 %v2014_v23, %v2014_v23  ;;  %v635_v48 = vmul.f32 %v2017_v31, %v2017_v31 }
  0xcc   :  { %v487_v50 = vmul.f32 0.00390625, %v363_v11  ;;  %v636_v53 = vmul.f32 %v2020_v18, %v2020_v18  ;;  %v637_v54 = vmul.f32 %v2023_v21, %v2023_v21  ;;  %v2034_v32 = vsub.f32 %v1711_v63, %v486_v49 }
  0xcd   :  { %v2037_v9 = vsub.f32 %v1713_v0, %v486_v49  ;;  %v736_v33 = vadd.f32 %v635_v48, %v634_v47  ;;  %v366_v39 = vpop.xlane.xlu0 %365 }
  0xce   :  { %v2040_v34 = vsub.f32 %v1717_v5, %v487_v50  ;;  %v2043_v38 = vsub.f32 %v1719_v6, %v487_v50  ;;  %v488_v17 = vmul.f32 0.00390625, %v366_v39  ;;  %v739_v11 = vadd.f32 %v637_v54, %v636_v53 }
  0xcf   :  { %734 = vadd.xlane.f32.xlu1 %v733_v3  ;;  %737 = vadd.xlane.f32.xlu0 %v736_v33  ;;  %v369_v24 = vpop.xlane.xlu1 %368  ;;  %v638_v63 = vmul.f32 %v2034_v32, %v2034_v32  ;;  %v639_v0 = vmul.f32 %v2037_v9, %v2037_v9 }
  0xd0   :  { %v489_v49 = vmul.f32 0.00390625, %v369_v24  ;;  %v640_v5 = vmul.f32 %v2040_v34, %v2040_v34  ;;  %v641_v6 = vmul.f32 %v2043_v38, %v2043_v38  ;;  %v2054_v47 = vsub.f32 %v1723_v19, %v488_v17 }
  0xd1   :  { %v2057_v3 = vsub.f32 %v1725_v20, %v488_v17  ;;  %v742_v48 = vadd.f32 %v639_v0, %v638_v63  ;;  %v372_v54 = vpop.xlane.xlu0 %371 }
  0xd2   :  { %v2060_v50 = vsub.f32 %v1729_v25, %v489_v49  ;;  %v2063_v53 = vsub.f32 %v1731_v26, %v489_v49  ;;  %v490_v33 = vmul.f32 0.00390625, %v372_v54  ;;  %v745_v24 = vadd.f32 %v641_v6, %v640_v5 }
  0xd3   :  { %740 = vadd.xlane.f32.xlu1 %v739_v11  ;;  %743 = vadd.xlane.f32.xlu0 %v742_v48  ;;  %v375_v39 = vpop.xlane.xlu1 %374  ;;  %v642_v19 = vmul.f32 %v2054_v47, %v2054_v47  ;;  %v643_v20 = vmul.f32 %v2057_v3, %v2057_v3 }
  0xd4   :  { %v491_v17 = vmul.f32 0.00390625, %v375_v39  ;;  %v644_v25 = vmul.f32 %v2060_v50, %v2060_v50  ;;  %v645_v26 = vmul.f32 %v2063_v53, %v2063_v53  ;;  %v2074_v63 = vsub.f32 %v1735_v37, %v490_v33 }
  0xd5   :  { %v2077_v11 = vsub.f32 %v1737_v40, %v490_v33  ;;  %v748_v0 = vadd.f32 %v643_v20, %v642_v19  ;;  %v378_v6 = vpop.xlane.xlu0 %377 }
  0xd6   :  { %v2080_v49 = vsub.f32 %v1741_v44, %v491_v17  ;;  %v2083_v5 = vsub.f32 %v1743_v45, %v491_v17  ;;  %v492_v48 = vmul.f32 0.00390625, %v378_v6  ;;  %v751_v39 = vadd.f32 %v645_v26, %v644_v25 }
  0xd7   :  { %746 = vadd.xlane.f32.xlu1 %v745_v24  ;;  %749 = vadd.xlane.f32.xlu0 %v748_v0  ;;  %v381_v54 = vpop.xlane.xlu1 %380  ;;  %v646_v37 = vmul.f32 %v2074_v63, %v2074_v63  ;;  %v647_v40 = vmul.f32 %v2077_v11, %v2077_v11 }
  0xd8   :  { %v493_v33 = vmul.f32 0.00390625, %v381_v54  ;;  %v648_v44 = vmul.f32 %v2080_v49, %v2080_v49  ;;  %v649_v45 = vmul.f32 %v2083_v5, %v2083_v5  ;;  %v2094_v19 = vsub.f32 %v1747_v57, %v492_v48 }
  0xd9   :  { %v2097_v24 = vsub.f32 %v1749_v58, %v492_v48  ;;  %v754_v20 = vadd.f32 %v647_v40, %v646_v37  ;;  %v384_v26 = vpop.xlane.xlu0 %383 }
  0xda   :  { %v2100_v17 = vsub.f32 %v1753_v62, %v493_v33  ;;  %v2103_v25 = vsub.f32 %v1755_v1, %v493_v33  ;;  %v494_v0 = vmul.f32 0.00390625, %v384_v26  ;;  %v757_v54 = vadd.f32 %v649_v45, %v648_v44 }
  0xdb   :  { %752 = vadd.xlane.f32.xlu1 %v751_v39  ;;  %755 = vadd.xlane.f32.xlu0 %v754_v20  ;;  %v387_v6 = vpop.xlane.xlu1 %386  ;;  %v650_v57 = vmul.f32 %v2094_v19, %v2094_v19  ;;  %v651_v58 = vmul.f32 %v2097_v24, %v2097_v24 }
  0xdc   :  { %v495_v48 = vmul.f32 0.00390625, %v387_v6  ;;  %v652_v62 = vmul.f32 %v2100_v17, %v2100_v17  ;;  %v653_v1 = vmul.f32 %v2103_v25, %v2103_v25  ;;  %v2114_v37 = vsub.f32 %v1759_v15, %v494_v0 }
  0xdd   :  { %v2117_v39 = vsub.f32 %v1761_v16, %v494_v0  ;;  %v760_v40 = vadd.f32 %v651_v58, %v650_v57  ;;  %v390_v45 = vpop.xlane.xlu0 %389 }
  0xde   :  { %v2120_v33 = vsub.f32 %v1765_v27, %v495_v48  ;;  %v2123_v44 = vsub.f32 %v1767_v29, %v495_v48  ;;  %v496_v20 = vmul.f32 0.00390625, %v390_v45  ;;  %v763_v6 = vadd.f32 %v653_v1, %v652_v62  ;;  %v2929_v48 = vld [vmem:[#allocation11_spill] sm:$0xff]  ;;  %v2931_v1 = vld [vmem:[#allocation12_spill] sm:$0xff] }
  0xdf   :  { %2924 = vst [vmem:[#allocation59_spill] sm:$0xff] %v2117_v39  ;;  %758 = vadd.xlane.f32.xlu1 %v757_v54  ;;  %761 = vadd.xlane.f32.xlu0 %v760_v40  ;;  %v393_v26 = vpop.xlane.xlu1 %392  ;;  %v654_v15 = vmul.f32 %v2114_v37, %v2114_v37  ;;  %v655_v16 = vmul.f32 %v2117_v39, %v2117_v39 }
  0xe0   :  { %2925 = vst [vmem:[#allocation60_spill] sm:$0xff] %v2120_v33  ;;  %2926 = vst [vmem:[#allocation61_spill] sm:$0xff] %v2123_v44  ;;  %v497_v0 = vmul.f32 0.00390625, %v393_v26  ;;  %v656_v27 = vmul.f32 %v2120_v33, %v2120_v33  ;;  %v657_v29 = vmul.f32 %v2123_v44, %v2123_v44  ;;  %v2134_v57 = vsub.f32 %v1771_v43, %v496_v20 }
  0xe1   :  { %v2137_v54 = vsub.f32 %v1773_v46, %v496_v20  ;;  %v766_v58 = vadd.f32 %v655_v16, %v654_v15  ;;  %v396_v45 = vpop.xlane.xlu0 %395 }
  0xe2   :  { %2927 = vst [vmem:[#allocation62_spill] sm:$0xff] %v2134_v57  ;;  %v2140_v62 = vsub.f32 %v2929_v48, %v497_v0  ;;  %v2143_v40 = vsub.f32 %v2931_v1, %v497_v0  ;;  %v498_v26 = vmul.f32 0.00390625, %v396_v45  ;;  %v769_v39 = vadd.f32 %v657_v29, %v656_v27  ;;  %v2933_v0 = vld [vmem:[#allocation13_spill] sm:$0xff]  ;;  %v2937_v29 = vld [vmem:[#allocation15_spill] sm:$0xff]  ;;  %v2939_v45 = vld [vmem:[#allocation16_spill] sm:$0xff] }
  0xe3   :  { %2928 = vst [vmem:[#allocation63_spill] sm:$0xff] %v2137_v54  ;;  %764 = vadd.xlane.f32.xlu1 %v763_v6  ;;  %767 = vadd.xlane.f32.xlu0 %v766_v58  ;;  %v399_v33 = vpop.xlane.xlu1 %398  ;;  %v658_v43 = vmul.f32 %v2134_v57, %v2134_v57  ;;  %v659_v46 = vmul.f32 %v2137_v54, %v2137_v54  ;;  %v2935_v6 = vld [vmem:[#allocation14_spill] sm:$0xff] }
  0xe4   :  { %2930 = vst [vmem:[#allocation11_spill] sm:$0xff] %v2140_v62  ;;  %2932 = vst [vmem:[#allocation12_spill] sm:$0xff] %v2143_v40  ;;  %v499_v20 = vmul.f32 0.00390625, %v399_v33  ;;  %v660_v15 = vmul.f32 %v2140_v62, %v2140_v62  ;;  %v661_v16 = vmul.f32 %v2143_v40, %v2143_v40  ;;  %v2154_v48 = vsub.f32 %v2933_v0, %v498_v26 }
  0xe5   :  { %v2157_v58 = vsub.f32 %v2935_v6, %v498_v26  ;;  %v772_v27 = vadd.f32 %v659_v46, %v658_v43  ;;  %v402_v33 = vpop.xlane.xlu0 %401 }
  0xe6   :  { %2934 = vst [vmem:[#allocation13_spill] sm:$0xff] %v2154_v48  ;;  %v2160_v1 = vsub.f32 %v2937_v29, %v499_v20  ;;  %v2163_v57 = vsub.f32 %v2939_v45, %v499_v20  ;;  %v500_v54 = vmul.f32 0.00390625, %v402_v33  ;;  %v775_v44 = vadd.f32 %v661_v16, %v660_v15  ;;  %v2941_v20 = vld [vmem:[#allocation17_spill] sm:$0xff]  ;;  %v2945_v16 = vld [vmem:[#allocation19_spill] sm:$0xff]  ;;  %v2947_v33 = vld [vmem:[#allocation20_spill] sm:$0xff] }
  0xe7   :  { %2936 = vst [vmem:[#allocation14_spill] sm:$0xff] %v2157_v58  ;;  %770 = vadd.xlane.f32.xlu1 %v769_v39  ;;  %773 = vadd.xlane.f32.xlu0 %v772_v27  ;;  %v405_v62 = vpop.xlane.xlu1 %404  ;;  %v662_v0 = vmul.f32 %v2154_v48, %v2154_v48  ;;  %v663_v26 = vmul.f32 %v2157_v58, %v2157_v58  ;;  %v2943_v39 = vld [vmem:[#allocation18_spill] sm:$0xff] }
  0xe8   :  { %2938 = vst [vmem:[#allocation15_spill] sm:$0xff] %v2160_v1  ;;  %2940 = vst [vmem:[#allocation16_spill] sm:$0xff] %v2163_v57  ;;  %v501_v6 = vmul.f32 0.00390625, %v405_v62  ;;  %v664_v43 = vmul.f32 %v2160_v1, %v2160_v1  ;;  %v665_v46 = vmul.f32 %v2163_v57, %v2163_v57  ;;  %v2174_v29 = vsub.f32 %v2941_v20, %v500_v54 }
  0xe9   :  { %v2177_v27 = vsub.f32 %v2943_v39, %v500_v54  ;;  %v778_v15 = vadd.f32 %v663_v26, %v662_v0  ;;  %v408_v62 = vpop.xlane.xlu0 %407 }
  0xea   :  { %2942 = vst [vmem:[#allocation17_spill] sm:$0xff] %v2174_v29  ;;  %v2180_v45 = vsub.f32 %v2945_v16, %v501_v6  ;;  %v2183_v48 = vsub.f32 %v2947_v33, %v501_v6  ;;  %v502_v58 = vmul.f32 0.00390625, %v408_v62  ;;  %v781_v40 = vadd.f32 %v665_v46, %v664_v43  ;;  %v2949_v6 = vld [vmem:[#allocation21_spill] sm:$0xff]  ;;  %v2953_v46 = vld [vmem:[#allocation23_spill] sm:$0xff]  ;;  %v2955_v62 = vld [vmem:[#allocation24_spill] sm:$0xff] }
  0xeb   :  { %2944 = vst [vmem:[#allocation18_spill] sm:$0xff] %v2177_v27  ;;  %776 = vadd.xlane.f32.xlu1 %v775_v44  ;;  %779 = vadd.xlane.f32.xlu0 %v778_v15  ;;  %v411_v1 = vpop.xlane.xlu1 %410  ;;  %v666_v20 = vmul.f32 %v2174_v29, %v2174_v29  ;;  %v667_v54 = vmul.f32 %v2177_v27, %v2177_v27  ;;  %v2951_v44 = vld [vmem:[#allocation22_spill] sm:$0xff] }
  0xec   :  { %2946 = vst [vmem:[#allocation19_spill] sm:$0xff] %v2180_v45  ;;  %2948 = vst [vmem:[#allocation20_spill] sm:$0xff] %v2183_v48  ;;  %v503_v39 = vmul.f32 0.00390625, %v411_v1  ;;  %v668_v0 = vmul.f32 %v2180_v45, %v2180_v45  ;;  %v669_v26 = vmul.f32 %v2183_v48, %v2183_v48  ;;  %v2194_v16 = vsub.f32 %v2949_v6, %v502_v58 }
  0xed   :  { %v2197_v15 = vsub.f32 %v2951_v44, %v502_v58  ;;  %v784_v43 = vadd.f32 %v667_v54, %v666_v20  ;;  %v414_v1 = vpop.xlane.xlu0 %413 }
  0xee   :  { %2950 = vst [vmem:[#allocation21_spill] sm:$0xff] %v2194_v16  ;;  %v2200_v33 = vsub.f32 %v2953_v46, %v503_v39  ;;  %v2203_v29 = vsub.f32 %v2955_v62, %v503_v39  ;;  %v504_v27 = vmul.f32 0.00390625, %v414_v1  ;;  %v787_v57 = vadd.f32 %v669_v26, %v668_v0  ;;  %v2957_v39 = vld [vmem:[#allocation25_spill] sm:$0xff]  ;;  %v2961_v26 = vld [vmem:[#allocation27_spill] sm:$0xff]  ;;  %v2963_v1 = vld [vmem:[#allocation28_spill] sm:$0xff] }
  0xef   :  { %2952 = vst [vmem:[#allocation22_spill] sm:$0xff] %v2197_v15  ;;  %782 = vadd.xlane.f32.xlu1 %v781_v40  ;;  %785 = vadd.xlane.f32.xlu0 %v784_v43  ;;  %v417_v45 = vpop.xlane.xlu1 %416  ;;  %v670_v6 = vmul.f32 %v2194_v16, %v2194_v16  ;;  %v671_v58 = vmul.f32 %v2197_v15, %v2197_v15  ;;  %v2959_v40 = vld [vmem:[#allocation26_spill] sm:$0xff] }
  0xf0   :  { %2954 = vst [vmem:[#allocation23_spill] sm:$0xff] %v2200_v33  ;;  %2956 = vst [vmem:[#allocation24_spill] sm:$0xff] %v2203_v29  ;;  %v505_v44 = vmul.f32 0.00390625, %v417_v45  ;;  %v672_v20 = vmul.f32 %v2200_v33, %v2200_v33  ;;  %v673_v54 = vmul.f32 %v2203_v29, %v2203_v29  ;;  %v2214_v46 = vsub.f32 %v2957_v39, %v504_v27 }
  0xf1   :  { %v2217_v43 = vsub.f32 %v2959_v40, %v504_v27  ;;  %v790_v0 = vadd.f32 %v671_v58, %v670_v6  ;;  %v420_v45 = vpop.xlane.xlu0 %419 }
  0xf2   :  { %2958 = vst [vmem:[#allocation25_spill] sm:$0xff] %v2214_v46  ;;  %v2220_v62 = vsub.f32 %v2961_v26, %v505_v44  ;;  %v2223_v16 = vsub.f32 %v2963_v1, %v505_v44  ;;  %v506_v15 = vmul.f32 0.00390625, %v420_v45  ;;  %v793_v48 = vadd.f32 %v673_v54, %v672_v20  ;;  %v2965_v44 = vld [vmem:[#allocation29_spill] sm:$0xff]  ;;  %v2969_v54 = vld [vmem:[#allocation31_spill] sm:$0xff]  ;;  %v2971_v45 = vld [vmem:[#allocation32_spill] sm:$0xff] }
  0xf3   :  { %2960 = vst [vmem:[#allocation26_spill] sm:$0xff] %v2217_v43  ;;  %788 = vadd.xlane.f32.xlu1 %v787_v57  ;;  %791 = vadd.xlane.f32.xlu0 %v790_v0  ;;  %v423_v33 = vpop.xlane.xlu1 %422  ;;  %v674_v39 = vmul.f32 %v2214_v46, %v2214_v46  ;;  %v675_v27 = vmul.f32 %v2217_v43, %v2217_v43  ;;  %v2967_v57 = vld [vmem:[#allocation30_spill] sm:$0xff] }
  0xf4   :  { %2962 = vst [vmem:[#allocation27_spill] sm:$0xff] %v2220_v62  ;;  %2964 = vst [vmem:[#allocation28_spill] sm:$0xff] %v2223_v16  ;;  %v507_v40 = vmul.f32 0.00390625, %v423_v33  ;;  %v676_v6 = vmul.f32 %v2220_v62, %v2220_v62  ;;  %v677_v58 = vmul.f32 %v2223_v16, %v2223_v16  ;;  %v2234_v26 = vsub.f32 %v2965_v44, %v506_v15 }
  0xf5   :  { %v2237_v0 = vsub.f32 %v2967_v57, %v506_v15  ;;  %v796_v20 = vadd.f32 %v675_v27, %v674_v39  ;;  %v426_v33 = vpop.xlane.xlu0 %425 }
  0xf6   :  { %2966 = vst [vmem:[#allocation29_spill] sm:$0xff] %v2234_v26  ;;  %v2240_v1 = vsub.f32 %v2969_v54, %v507_v40  ;;  %v2243_v46 = vsub.f32 %v2971_v45, %v507_v40  ;;  %v508_v43 = vmul.f32 0.00390625, %v426_v33  ;;  %v799_v29 = vadd.f32 %v677_v58, %v676_v6  ;;  %v2973_v40 = vld [vmem:[#allocation33_spill] sm:$0xff]  ;;  %v2977_v58 = vld [vmem:[#allocation35_spill] sm:$0xff]  ;;  %v2979_v33 = vld [vmem:[#allocation36_spill] sm:$0xff] }
  0xf7   :  { %2968 = vst [vmem:[#allocation30_spill] sm:$0xff] %v2237_v0  ;;  %794 = vadd.xlane.f32.xlu1 %v793_v48  ;;  %797 = vadd.xlane.f32.xlu0 %v796_v20  ;;  %v429_v62 = vpop.xlane.xlu1 %428  ;;  %v678_v44 = vmul.f32 %v2234_v26, %v2234_v26  ;;  %v679_v15 = vmul.f32 %v2237_v0, %v2237_v0  ;;  %v2975_v48 = vld [vmem:[#allocation34_spill] sm:$0xff] }
  0xf8   :  { %2970 = vst [vmem:[#allocation31_spill] sm:$0xff] %v2240_v1  ;;  %2972 = vst [vmem:[#allocation32_spill] sm:$0xff] %v2243_v46  ;;  %v509_v57 = vmul.f32 0.00390625, %v429_v62  ;;  %v680_v39 = vmul.f32 %v2240_v1, %v2240_v1  ;;  %v681_v27 = vmul.f32 %v2243_v46, %v2243_v46  ;;  %v2254_v54 = vsub.f32 %v2973_v40, %v508_v43 }
  0xf9   :  { %v2257_v20 = vsub.f32 %v2975_v48, %v508_v43  ;;  %v802_v6 = vadd.f32 %v679_v15, %v678_v44  ;;  %v432_v62 = vpop.xlane.xlu0 %431 }
  0xfa   :  { %2974 = vst [vmem:[#allocation33_spill] sm:$0xff] %v2254_v54  ;;  %v2260_v45 = vsub.f32 %v2977_v58, %v509_v57  ;;  %v2263_v26 = vsub.f32 %v2979_v33, %v509_v57  ;;  %v510_v0 = vmul.f32 0.00390625, %v432_v62  ;;  %v805_v16 = vadd.f32 %v681_v27, %v680_v39  ;;  %v2981_v57 = vld [vmem:[#allocation37_spill] sm:$0xff]  ;;  %v2985_v27 = vld [vmem:[#allocation39_spill] sm:$0xff]  ;;  %v2987_v62 = vld [vmem:[#allocation40_spill] sm:$0xff] }
  0xfb   :  { %2976 = vst [vmem:[#allocation34_spill] sm:$0xff] %v2257_v20  ;;  %800 = vadd.xlane.f32.xlu1 %v799_v29  ;;  %803 = vadd.xlane.f32.xlu0 %v802_v6  ;;  %v435_v1 = vpop.xlane.xlu1 %434  ;;  %v682_v40 = vmul.f32 %v2254_v54, %v2254_v54  ;;  %v683_v43 = vmul.f32 %v2257_v20, %v2257_v20  ;;  %v2983_v29 = vld [vmem:[#allocation38_spill] sm:$0xff] }
  0xfc   :  { %2978 = vst [vmem:[#allocation35_spill] sm:$0xff] %v2260_v45  ;;  %2980 = vst [vmem:[#allocation36_spill] sm:$0xff] %v2263_v26  ;;  %v511_v48 = vmul.f32 0.00390625, %v435_v1  ;;  %v684_v44 = vmul.f32 %v2260_v45, %v2260_v45  ;;  %v685_v15 = vmul.f32 %v2263_v26, %v2263_v26  ;;  %v2274_v58 = vsub.f32 %v2981_v57, %v510_v0 }
  0xfd   :  { %v2277_v6 = vsub.f32 %v2983_v29, %v510_v0  ;;  %v808_v39 = vadd.f32 %v683_v43, %v682_v40  ;;  %v438_v1 = vpop.xlane.xlu0 %437 }
  0xfe   :  { %2982 = vst [vmem:[#allocation37_spill] sm:$0xff] %v2274_v58  ;;  %v2280_v33 = vsub.f32 %v2985_v27, %v511_v48  ;;  %v2283_v54 = vsub.f32 %v2987_v62, %v511_v48  ;;  %v512_v20 = vmul.f32 0.00390625, %v438_v1  ;;  %v811_v46 = vadd.f32 %v685_v15, %v684_v44  ;;  %v2989_v48 = vld [vmem:[#allocation41_spill] sm:$0xff]  ;;  %v2993_v15 = vld [vmem:[#allocation43_spill] sm:$0xff]  ;;  %v2995_v1 = vld [vmem:[#allocation44_spill] sm:$0xff] }
  0xff   :  { %2984 = vst [vmem:[#allocation38_spill] sm:$0xff] %v2277_v6  ;;  %806 = vadd.xlane.f32.xlu1 %v805_v16  ;;  %809 = vadd.xlane.f32.xlu0 %v808_v39  ;;  %v441_v45 = vpop.xlane.xlu1 %440  ;;  %v686_v57 = vmul.f32 %v2274_v58, %v2274_v58  ;;  %v687_v0 = vmul.f32 %v2277_v6, %v2277_v6  ;;  %v2991_v16 = vld [vmem:[#allocation42_spill] sm:$0xff] }
 0x100   :  { %2986 = vst [vmem:[#allocation39_spill] sm:$0xff] %v2280_v33  ;;  %2988 = vst [vmem:[#allocation40_spill] sm:$0xff] %v2283_v54  ;;  %v513_v29 = vmul.f32 0.00390625, %v441_v45  ;;  %v688_v40 = vmul.f32 %v2280_v33, %v2280_v33  ;;  %v689_v43 = vmul.f32 %v2283_v54, %v2283_v54  ;;  %v2294_v27 = vsub.f32 %v2989_v48, %v512_v20 }
 0x101   :  { %v2297_v39 = vsub.f32 %v2991_v16, %v512_v20  ;;  %v814_v44 = vadd.f32 %v687_v0, %v686_v57  ;;  %v444_v45 = vpop.xlane.xlu0 %443 }
 0x102   :  { %2990 = vst [vmem:[#allocation41_spill] sm:$0xff] %v2294_v27  ;;  %v2300_v62 = vsub.f32 %v2993_v15, %v513_v29  ;;  %v2303_v58 = vsub.f32 %v2995_v1, %v513_v29  ;;  %v514_v6 = vmul.f32 0.00390625, %v444_v45  ;;  %v817_v26 = vadd.f32 %v689_v43, %v688_v40  ;;  %v2997_v29 = vld [vmem:[#allocation45_spill] sm:$0xff]  ;;  %v3001_v43 = vld [vmem:[#allocation47_spill] sm:$0xff]  ;;  %v3003_v45 = vld [vmem:[#allocation48_spill] sm:$0xff] }
 0x103   :  { %2992 = vst [vmem:[#allocation42_spill] sm:$0xff] %v2297_v39  ;;  %812 = vadd.xlane.f32.xlu1 %v811_v46  ;;  %815 = vadd.xlane.f32.xlu0 %v814_v44  ;;  %v447_v33 = vpop.xlane.xlu1 %446  ;;  %v690_v48 = vmul.f32 %v2294_v27, %v2294_v27  ;;  %v691_v20 = vmul.f32 %v2297_v39, %v2297_v39  ;;  %v2999_v46 = vld [vmem:[#allocation46_spill] sm:$0xff] }
 0x104   :  { %2994 = vst [vmem:[#allocation43_spill] sm:$0xff] %v2300_v62  ;;  %2996 = vst [vmem:[#allocation44_spill] sm:$0xff] %v2303_v58  ;;  %v515_v16 = vmul.f32 0.00390625, %v447_v33  ;;  %v692_v57 = vmul.f32 %v2300_v62, %v2300_v62  ;;  %v693_v0 = vmul.f32 %v2303_v58, %v2303_v58  ;;  %v2314_v15 = vsub.f32 %v2997_v29, %v514_v6 }
 0x105   :  { %v2317_v44 = vsub.f32 %v2999_v46, %v514_v6  ;;  %v820_v40 = vadd.f32 %v691_v20, %v690_v48  ;;  %v450_v33 = vpop.xlane.xlu0 %449 }
 0x106   :  { %2998 = vst [vmem:[#allocation45_spill] sm:$0xff] %v2314_v15  ;;  %v2320_v1 = vsub.f32 %v3001_v43, %v515_v16  ;;  %v2323_v27 = vsub.f32 %v3003_v45, %v515_v16  ;;  %v516_v39 = vmul.f32 0.00390625, %v450_v33  ;;  %v823_v54 = vadd.f32 %v693_v0, %v692_v57  ;;  %v3005_v16 = vld [vmem:[#allocation49_spill] sm:$0xff]  ;;  %v3009_v0 = vld [vmem:[#allocation51_spill] sm:$0xff]  ;;  %v3011_v33 = vld [vmem:[#allocation52_spill] sm:$0xff] }
 0x107   :  { %3000 = vst [vmem:[#allocation46_spill] sm:$0xff] %v2317_v44  ;;  %818 = vadd.xlane.f32.xlu1 %v817_v26  ;;  %821 = vadd.xlane.f32.xlu0 %v820_v40  ;;  %v453_v62 = vpop.xlane.xlu1 %452  ;;  %v694_v29 = vmul.f32 %v2314_v15, %v2314_v15  ;;  %v695_v6 = vmul.f32 %v2317_v44, %v2317_v44  ;;  %v3007_v26 = vld [vmem:[#allocation50_spill] sm:$0xff] }
 0x108   :  { %3002 = vst [vmem:[#allocation47_spill] sm:$0xff] %v2320_v1  ;;  %3004 = vst [vmem:[#allocation48_spill] sm:$0xff] %v2323_v27  ;;  %v517_v46 = vmul.f32 0.00390625, %v453_v62  ;;  %v696_v48 = vmul.f32 %v2320_v1, %v2320_v1  ;;  %v697_v20 = vmul.f32 %v2323_v27, %v2323_v27  ;;  %v2334_v43 = vsub.f32 %v3005_v16, %v516_v39 }
 0x109   :  { %v2337_v40 = vsub.f32 %v3007_v26, %v516_v39  ;;  %v826_v57 = vadd.f32 %v695_v6, %v694_v29  ;;  %v456_v62 = vpop.xlane.xlu0 %455 }
 0x10a   :  { %3006 = vst [vmem:[#allocation49_spill] sm:$0xff] %v2334_v43  ;;  %v2340_v45 = vsub.f32 %v3009_v0, %v517_v46  ;;  %v2343_v15 = vsub.f32 %v3011_v33, %v517_v46  ;;  %v518_v44 = vmul.f32 0.00390625, %v456_v62  ;;  %v829_v58 = vadd.f32 %v697_v20, %v696_v48  ;;  %v3012_v46 = vld [vmem:[#allocation53_spill] sm:$0xff]  ;;  %v3014_v20 = vld [vmem:[#allocation55_spill] sm:$0xff]  ;;  %v3016_v62 = vld [vmem:[#allocation56_spill] sm:$0xff] }
 0x10b   :  { %3008 = vst [vmem:[#allocation50_spill] sm:$0xff] %v2337_v40  ;;  %824 = vadd.xlane.f32.xlu1 %v823_v54  ;;  %827 = vadd.xlane.f32.xlu0 %v826_v57  ;;  %v459_v1 = vpop.xlane.xlu1 %458  ;;  %v698_v16 = vmul.f32 %v2334_v43, %v2334_v43  ;;  %v699_v39 = vmul.f32 %v2337_v40, %v2337_v40  ;;  %v3013_v54 = vld [vmem:[#allocation54_spill] sm:$0xff] }
 0x10c   :  { %3010 = vst [vmem:[#allocation51_spill] sm:$0xff] %v2340_v45  ;;  %v519_v26 = vmul.f32 0.00390625, %v459_v1  ;;  %v700_v29 = vmul.f32 %v2340_v45, %v2340_v45  ;;  %v701_v6 = vmul.f32 %v2343_v15, %v2343_v15  ;;  %v2354_v0 = vsub.f32 %v3012_v46, %v518_v44 }
 0x10d   :  { %v2357_v57 = vsub.f32 %v3013_v54, %v518_v44  ;;  %v832_v48 = vadd.f32 %v699_v39, %v698_v16  ;;  %v462_v1 = vpop.xlane.xlu0 %461 }
 0x10e   :  { %v2360_v33 = vsub.f32 %v3014_v20, %v519_v26  ;;  %v2363_v43 = vsub.f32 %v3016_v62, %v519_v26  ;;  %v520_v40 = vmul.f32 0.00390625, %v462_v1  ;;  %v835_v27 = vadd.f32 %v701_v6, %v700_v29 }
 0x10f   :  { %830 = vadd.xlane.f32.xlu1 %v829_v58  ;;  %833 = vadd.xlane.f32.xlu0 %v832_v48  ;;  %v465_v45 = vpop.xlane.xlu1 %464  ;;  %v702_v46 = vmul.f32 %v2354_v0, %v2354_v0  ;;  %v703_v44 = vmul.f32 %v2357_v57, %v2357_v57  ;;  %v3017_v58 = vld [vmem:[#allocation57_spill] sm:$0xff] }
 0x110   :  { %3015 = vst [vmem:[#allocation52_spill] sm:$0xff] %v2360_v33  ;;  %v521_v54 = vmul.f32 0.00390625, %v465_v45  ;;  %v704_v16 = vmul.f32 %v2360_v33, %v2360_v33  ;;  %v705_v39 = vmul.f32 %v2363_v43, %v2363_v43  ;;  %v2374_v26 = vsub.f32 %v1915_v56, %v520_v40 }
 0x111   :  { %v2377_v48 = vsub.f32 %v3017_v58, %v520_v40  ;;  %v838_v29 = vadd.f32 %v703_v44, %v702_v46  ;;  %v468_v45 = vpop.xlane.xlu0 %467 }
 0x112   :  { %v2380_v6 = vsub.f32 %v1921_v55, %v521_v54  ;;  %v2383_v20 = vsub.f32 %v1923_v42, %v521_v54  ;;  %v522_v62 = vmul.f32 0.00390625, %v468_v45  ;;  %v841_v33 = vadd.f32 %v705_v39, %v704_v16 }
 0x113   :  { %836 = vadd.xlane.f32.xlu1 %v835_v27  ;;  %839 = vadd.xlane.f32.xlu0 %v838_v29  ;;  %v471_v1 = vpop.xlane.xlu1 %470  ;;  %v706_v56 = vmul.f32 %v2374_v26, %v2374_v26  ;;  %v707_v40 = vmul.f32 %v2377_v48, %v2377_v48 }
 0x114   :  { %v523_v58 = vmul.f32 0.00390625, %v471_v1  ;;  %v708_v55 = vmul.f32 %v2380_v6, %v2380_v6  ;;  %v709_v42 = vmul.f32 %v2383_v20, %v2383_v20  ;;  %v2394_v46 = vsub.f32 %v1927_v30, %v522_v62 }
 0x115   :  { %v2397_v27 = vsub.f32 %v1929_v61, %v522_v62  ;;  %v844_v44 = vadd.f32 %v707_v40, %v706_v56  ;;  %v474_v39 = vpop.xlane.xlu0 %473 }
 0x116   :  { %v2400_v54 = vsub.f32 %v1933_v22, %v523_v58  ;;  %v2403_v16 = vsub.f32 %v1935_v13, %v523_v58  ;;  %v524_v29 = vmul.f32 0.00390625, %v474_v39  ;;  %v847_v1 = vadd.f32 %v709_v42, %v708_v55 }
 0x117   :  { %842 = vadd.xlane.f32.xlu1 %v841_v33  ;;  %845 = vadd.xlane.f32.xlu0 %v844_v44  ;;  %v477_v45 = vpop.xlane.xlu1 %476  ;;  %v710_v30 = vmul.f32 %v2394_v46, %v2394_v46  ;;  %v711_v61 = vmul.f32 %v2397_v27, %v2397_v27 }
 0x118   :  { %3018 = vst [vmem:[#allocation53_spill] sm:$0xff] %v2403_v16  ;;  %v525_v62 = vmul.f32 0.00390625, %v477_v45  ;;  %v712_v22 = vmul.f32 %v2400_v54, %v2400_v54  ;;  %v713_v13 = vmul.f32 %v2403_v16, %v2403_v16  ;;  %v2414_v56 = vsub.f32 %v1939_v2, %v524_v29 }
 0x119   :  { %v2417_v33 = vsub.f32 %v1941_v36, %v524_v29  ;;  %v850_v40 = vadd.f32 %v711_v61, %v710_v30 }
 0x11a   :  { %3019 = vst [vmem:[#allocation54_spill] sm:$0xff] %v2414_v56  ;;  %v2420_v58 = vsub.f32 %v1945_v60, %v525_v62  ;;  %v2423_v55 = vsub.f32 %v1947_v51, %v525_v62  ;;  %v853_v42 = vadd.f32 %v713_v13, %v712_v22  ;;  %v714_v44 = vmul.f32 %v2414_v56, %v2414_v56 }
 0x11b   :  { %3020 = vst [vmem:[#allocation55_spill] sm:$0xff] %v2417_v33  ;;  %848 = vadd.xlane.f32.xlu1 %v847_v1  ;;  %851 = vadd.xlane.f32.xlu0 %v850_v40  ;;  %v715_v2 = vmul.f32 %v2417_v33, %v2417_v33  ;;  %v1105_v1 = vlaneseq }
 0x11c   :  { %3021 = vst [vmem:[#allocation56_spill] sm:$0xff] %v2420_v58  ;;  %3022 = vst [vmem:[#allocation57_spill] sm:$0xff] %v2423_v55  ;;  %v716_v36 = vmul.f32 %v2420_v58, %v2420_v58  ;;  %v717_v39 = vmul.f32 %v2423_v55, %v2423_v55 }
 0x11d   :  { %v856_v60 = vadd.f32 %v715_v2, %v714_v44  ;;  %v1106_v40 = vshrl.u32 %v1105_v1, 7  ;;  %v1007_v1 = vld [vmem:[%s2774_s3] sm:$0x3] }
 0x11e   :  { %v859_v51 = vadd.f32 %v717_v39, %v716_v36  ;;  %v1006_v39 = vld [vmem:[%s2773_s2] sm:$0x3]  ;;  %s1609_s2 = smov [#allocation7]  }
 0x11f   :  { %854 = vadd.xlane.f32.xlu1 %v853_v42  ;;  %857 = vadd.xlane.f32.xlu0 %v856_v60  ;;  %v1107_v2 = vsub.s32 0, %v1106_v40  ;;  %v1111_v36 = vsub.s32 1, %v1106_v40  ;;  %s1419_s3 = sshll.u32 %s1609_s2, 4  ;;  %s1420_s3 = int_to_ptr.vmem [resolvable:$true] %s1419_s3 }
 0x120   :  { %s1577_s17 = scalar_lea.vmem %s1420_s3, 12288  ;;  %p1582_p3 = scmp.lt.s32.totalorder %s1420_s3, %s1420_s3 }
 0x121   :  { %p1578_p2 = scmp.ne.s32.totalorder %s1420_s3, %s1577_s17  ;;  %p1583_p4 = scmp.lt.s32.totalorder %s1577_s17, %s1577_s17 }
 0x123   :  { %860 = vadd.xlane.f32.xlu1 %v859_v51  ;;  %p1584_p5 = por %p1583_p4, %p1582_p3 }
 0x125   :  { %p1585_p6 = pnand %p1584_p5, %p1578_p2 }
 0x150   :  { %v720_v29 = vpop.xlane.xlu0 %719 }
 0x151   :  { %v862_v45 = vmul.f32 0.00390625, %v720_v29 }
 0x153   :  { %v910_v30 = vadd.f32 1e-12, %v862_v45 }
 0x154   :  { %v723_v61 = vpop.xlane.xlu1 %722  ;;  %v726_v62 = vpop.xlane.xlu0 %725 }
 0x155   :  { %1437 = vrsqrt.f32 %v910_v30  ;;  %v863_v22 = vmul.f32 0.00390625, %v723_v61  ;;  %v864_v13 = vmul.f32 0.00390625, %v726_v62 }
 0x157   :  { %v911_v33 = vadd.f32 1e-12, %v863_v22  ;;  %v912_v58 = vadd.f32 1e-12, %v864_v13  ;;  %v2443_v22 = vrot.slane %v1007_v1, %v1107_v2  ;;  %v2445_v13 = vrot.slane %v1007_v1, %v1111_v36 }
 0x158   :  { %v729_v56 = vpop.xlane.xlu1 %728  ;;  %v732_v16 = vpop.xlane.xlu0 %731 }
 0x159   :  { %1439 = vrsqrt.f32 %v911_v33  ;;  %v865_v44 = vmul.f32 0.00390625, %v729_v56  ;;  %v866_v42 = vmul.f32 0.00390625, %v732_v16  ;;  %v2439_v56 = vrot.slane %v1006_v39, %v1107_v2 }
 0x15a   :  { %1441 = vrsqrt.f32 %v912_v58  ;;  %v2441_v16 = vrot.slane %v1006_v39, %v1111_v36 }
 0x15b   :  { %v913_v60 = vadd.f32 1e-12, %v865_v44  ;;  %v914_v51 = vadd.f32 1e-12, %v866_v42 }
 0x15c   :  { %v735_v29 = vpop.xlane.xlu1 %734  ;;  %v738_v45 = vpop.xlane.xlu0 %737 }
 0x15d   :  { %1443 = vrsqrt.f32 %v913_v60  ;;  %v867_v30 = vmul.f32 0.00390625, %v735_v29  ;;  %v868_v33 = vmul.f32 0.00390625, %v738_v45 }
 0x15e   :  { %1445 = vrsqrt.f32 %v914_v51 }
 0x15f   :  { %v1438_v58 = vpop.eup %1437  ;;  %v915_v61 = vadd.f32 1e-12, %v867_v30  ;;  %v916_v62 = vadd.f32 1e-12, %v868_v33 }
 0x160   :  { %v1008_v40 = vmul.f32 %v1438_v58, %v1954_v10  ;;  %v1009_v44 = vmul.f32 %v1438_v58, %v1957_v14  ;;  %v741_v42 = vpop.xlane.xlu1 %740  ;;  %v744_v60 = vpop.xlane.xlu0 %743 }
 0x161   :  { %1447 = vrsqrt.f32 %v915_v61  ;;  %v869_v29 = vmul.f32 0.00390625, %v741_v42  ;;  %v870_v45 = vmul.f32 0.00390625, %v744_v60 }
 0x162   :  { %v1115_v39 = vmul.f32 %v2439_v56, %v1008_v40  ;;  %v1116_v51 = vmul.f32 %v2441_v16, %v1009_v44  ;;  %1449 = vrsqrt.f32 %v916_v62  ;;  %v3023_v40 = vld [vmem:[#allocation58_spill] sm:$0xff] }
 0x163   :  { %v1440_v30 = vpop.eup %1439  ;;  %v917_v33 = vadd.f32 1e-12, %v869_v29  ;;  %v918_v2 = vadd.f32 1e-12, %v870_v45 }
 0x164   :  { %v1442_v55 = vpop.eup %1441  ;;  %v1222_v36 = vadd.f32 %v2443_v22, %v1115_v39  ;;  %v1223_v10 = vadd.f32 %v2445_v13, %v1116_v51  ;;  %v1010_v14 = vmul.f32 %v1440_v30, %v1974_v52  ;;  %v1011_v1 = vmul.f32 %v1440_v30, %v1977_v12  ;;  %v747_v58 = vpop.xlane.xlu1 %746 }
 0x165   :  { %v750_v61 = vpop.xlane.xlu0 %749  ;;  %v1012_v42 = vmul.f32 %v1442_v55, %v1960_v35  ;;  %v1013_v60 = vmul.f32 %v1442_v55, %v3023_v40  ;;  %1451 = vrsqrt.f32 %v917_v33  ;;  %v871_v62 = vmul.f32 0.00390625, %v747_v58 }
 0x166   :  { %1318 = vst [vmem:[#allocation7] sm:$0xff] %v1222_v36  ;;  %1319 = vst [vmem:[#allocation7 + $0x8] sm:$0xff] %v1223_v10  ;;  %v1117_v44 = vmul.f32 %v2439_v56, %v1010_v14  ;;  %v1118_v29 = vmul.f32 %v2441_v16, %v1011_v1  ;;  %1453 = vrsqrt.f32 %v918_v2  ;;  %v872_v45 = vmul.f32 0.00390625, %v750_v61 }
 0x167   :  { %v1444_v39 = vpop.eup %1443  ;;  %v1119_v52 = vmul.f32 %v2439_v56, %v1012_v42  ;;  %v1120_v12 = vmul.f32 %v2441_v16, %v1013_v60  ;;  %v919_v51 = vadd.f32 1e-12, %v871_v62 }
 0x168   :  { %v1446_v30 = vpop.eup %1445  ;;  %v1224_v35 = vadd.f32 %v2443_v22, %v1117_v44  ;;  %v1225_v55 = vadd.f32 %v2445_v13, %v1118_v29  ;;  %v1014_v33 = vmul.f32 %v1444_v39, %v1980_v8  ;;  %v1015_v36 = vmul.f32 %v1444_v39, %v1983_v59  ;;  %v753_v10 = vpop.xlane.xlu1 %752 }
 0x169   :  { %v756_v14 = vpop.xlane.xlu0 %755  ;;  %v1226_v2 = vadd.f32 %v2443_v22, %v1119_v52  ;;  %v1227_v1 = vadd.f32 %v2445_v13, %v1120_v12  ;;  %v1016_v58 = vmul.f32 %v1446_v30, %v1994_v28  ;;  %v1017_v61 = vmul.f32 %v1446_v30, %v1997_v41 }
 0x16a   :  { %1320 = vst [vmem:[#allocation7 + $0x10] sm:$0xff] %v1224_v35  ;;  %1321 = vst [vmem:[#allocation7 + $0x18] sm:$0xff] %v1225_v55  ;;  %v1121_v42 = vmul.f32 %v2439_v56, %v1014_v33  ;;  %v1122_v40 = vmul.f32 %v2441_v16, %v1015_v36  ;;  %1455 = vrsqrt.f32 %v919_v51  ;;  %v920_v8 = vadd.f32 1e-12, %v872_v45 }
 0x16b   :  { %v1448_v60 = vpop.eup %1447  ;;  %1322 = vst [vmem:[#allocation7 + $0x20] sm:$0xff] %v1226_v2  ;;  %1323 = vst [vmem:[#allocation7 + $0x28] sm:$0xff] %v1227_v1  ;;  %v1123_v59 = vmul.f32 %v2439_v56, %v1016_v58  ;;  %v1124_v62 = vmul.f32 %v2441_v16, %v1017_v61  ;;  %v873_v44 = vmul.f32 0.00390625, %v753_v10  ;;  %v874_v29 = vmul.f32 0.00390625, %v756_v14 }
 0x16c   :  { %v1450_v28 = vpop.eup %1449  ;;  %v1228_v41 = vadd.f32 %v2443_v22, %v1121_v42  ;;  %v1229_v39 = vadd.f32 %v2445_v13, %v1122_v40  ;;  %v1018_v52 = vmul.f32 %v1448_v60, %v2000_v4  ;;  %v1019_v12 = vmul.f32 %v1448_v60, %v2003_v7  ;;  %v759_v51 = vpop.xlane.xlu1 %758 }
 0x16d   :  { %v762_v45 = vpop.xlane.xlu0 %761  ;;  %v1230_v30 = vadd.f32 %v2443_v22, %v1123_v59  ;;  %v1231_v35 = vadd.f32 %v2445_v13, %v1124_v62  ;;  %v1020_v55 = vmul.f32 %v1450_v28, %v2014_v23  ;;  %v1021_v33 = vmul.f32 %v1450_v28, %v2017_v31 }
 0x16e   :  { %1324 = vst [vmem:[#allocation7 + $0x30] sm:$0xff] %v1228_v41  ;;  %1325 = vst [vmem:[#allocation7 + $0x38] sm:$0xff] %v1229_v39  ;;  %v1125_v36 = vmul.f32 %v2439_v56, %v1018_v52  ;;  %v1126_v10 = vmul.f32 %v2441_v16, %v1019_v12  ;;  %1457 = vrsqrt.f32 %v920_v8  ;;  %v921_v4 = vadd.f32 1e-12, %v873_v44 }
 0x16f   :  { %v1452_v14 = vpop.eup %1451  ;;  %1326 = vst [vmem:[#allocation7 + $0x40] sm:$0xff] %v1230_v30  ;;  %1327 = vst [vmem:[#allocation7 + $0x48] sm:$0xff] %v1231_v35  ;;  %v1127_v7 = vmul.f32 %v2439_v56, %v1020_v55  ;;  %v1128_v2 = vmul.f32 %v2441_v16, %v1021_v33  ;;  %v922_v1 = vadd.f32 1e-12, %v874_v29  ;;  %v875_v58 = vmul.f32 0.00390625, %v759_v51 }
 0x170   :  { %v1454_v23 = vpop.eup %1453  ;;  %v1232_v31 = vadd.f32 %v2443_v22, %v1125_v36  ;;  %v1233_v61 = vadd.f32 %v2445_v13, %v1126_v10  ;;  %v1022_v42 = vmul.f32 %v1452_v14, %v2020_v18  ;;  %v1023_v40 = vmul.f32 %v1452_v14, %v2023_v21  ;;  %v765_v8 = vpop.xlane.xlu1 %764 }
 0x171   :  { %v768_v60 = vpop.xlane.xlu0 %767  ;;  %v1234_v59 = vadd.f32 %v2443_v22, %v1127_v7  ;;  %v1235_v62 = vadd.f32 %v2445_v13, %v1128_v2  ;;  %v1024_v44 = vmul.f32 %v1454_v23, %v2034_v32  ;;  %v1025_v29 = vmul.f32 %v1454_v23, %v2037_v9 }
 0x172   :  { %1328 = vst [vmem:[#allocation7 + $0x50] sm:$0xff] %v1232_v31  ;;  %1329 = vst [vmem:[#allocation7 + $0x58] sm:$0xff] %v1233_v61  ;;  %v1129_v28 = vmul.f32 %v2439_v56, %v1022_v42  ;;  %v1130_v41 = vmul.f32 %v2441_v16, %v1023_v40  ;;  %1459 = vrsqrt.f32 %v921_v4  ;;  %v923_v18 = vadd.f32 1e-12, %v875_v58 }
 0x173   :  { %1330 = vst [vmem:[#allocation7 + $0x60] sm:$0xff] %v1234_v59  ;;  %1331 = vst [vmem:[#allocation7 + $0x68] sm:$0xff] %v1235_v62  ;;  %v1131_v21 = vmul.f32 %v2439_v56, %v1024_v44  ;;  %v1132_v39 = vmul.f32 %v2441_v16, %v1025_v29  ;;  %1461 = vrsqrt.f32 %v922_v1  ;;  %v876_v52 = vmul.f32 0.00390625, %v762_v45 }
 0x174   :  { %v1456_v12 = vpop.eup %1455  ;;  %v1236_v32 = vadd.f32 %v2443_v22, %v1129_v28  ;;  %v1237_v9 = vadd.f32 %v2445_v13, %v1130_v41  ;;  %1463 = vrsqrt.f32 %v923_v18  ;;  %v877_v51 = vmul.f32 0.00390625, %v765_v8  ;;  %v771_v30 = vpop.xlane.xlu1 %770 }
 0x175   :  { %v774_v35 = vpop.xlane.xlu0 %773  ;;  %v1238_v55 = vadd.f32 %v2443_v22, %v1131_v21  ;;  %v1239_v33 = vadd.f32 %v2445_v13, %v1132_v39  ;;  %v1026_v36 = vmul.f32 %v1456_v12, %v2040_v34  ;;  %v1027_v10 = vmul.f32 %v1456_v12, %v2043_v38 }
 0x176   :  { %1332 = vst [vmem:[#allocation7 + $0x70] sm:$0xff] %v1236_v32  ;;  %1333 = vst [vmem:[#allocation7 + $0x78] sm:$0xff] %v1237_v9  ;;  %v924_v45 = vadd.f32 1e-12, %v876_v52  ;;  %v925_v4 = vadd.f32 1e-12, %v877_v51 }
 0x177   :  { %v878_v14 = vmul.f32 0.00390625, %v768_v60  ;;  %v879_v7 = vmul.f32 0.00390625, %v771_v30  ;;  %1334 = vst [vmem:[#allocation7 + $0x80] sm:$0xff] %v1238_v55  ;;  %1335 = vst [vmem:[#allocation7 + $0x88] sm:$0xff] %v1239_v33  ;;  %v1133_v2 = vmul.f32 %v2439_v56, %v1026_v36  ;;  %v1134_v1 = vmul.f32 %v2441_v16, %v1027_v10 }
 0x178   :  { %v880_v58 = vmul.f32 0.00390625, %v774_v35  ;;  %v1458_v23 = vpop.eup %1457  ;;  %1465 = vrsqrt.f32 %v924_v45  ;;  %v777_v34 = vpop.xlane.xlu1 %776 }
 0x179   :  { %v926_v31 = vadd.f32 1e-12, %v878_v14  ;;  %v927_v61 = vadd.f32 1e-12, %v879_v7  ;;  %v780_v42 = vpop.xlane.xlu0 %779  ;;  %v1240_v38 = vadd.f32 %v2443_v22, %v1133_v2  ;;  %v1241_v40 = vadd.f32 %v2445_v13, %v1134_v1 }
 0x17a   :  { %v1028_v8 = vmul.f32 %v1458_v23, %v2054_v47  ;;  %v1029_v60 = vmul.f32 %v1458_v23, %v2057_v3  ;;  %1467 = vrsqrt.f32 %v925_v4  ;;  %v928_v59 = vadd.f32 1e-12, %v880_v58 }
 0x17b   :  { %v881_v62 = vmul.f32 0.00390625, %v777_v34  ;;  %v882_v44 = vmul.f32 0.00390625, %v780_v42  ;;  %1336 = vst [vmem:[#allocation7 + $0x90] sm:$0xff] %v1240_v38  ;;  %1337 = vst [vmem:[#allocation7 + $0x98] sm:$0xff] %v1241_v40  ;;  %1469 = vrsqrt.f32 %v926_v31 }
 0x17c   :  { %v1135_v29 = vmul.f32 %v2439_v56, %v1028_v8  ;;  %v1136_v28 = vmul.f32 %v2441_v16, %v1029_v60  ;;  %v1460_v41 = vpop.eup %1459  ;;  %1471 = vrsqrt.f32 %v927_v61  ;;  %v783_v39 = vpop.xlane.xlu1 %782 }
 0x17d   :  { %v929_v18 = vadd.f32 1e-12, %v881_v62  ;;  %v930_v21 = vadd.f32 1e-12, %v882_v44  ;;  %v786_v52 = vpop.xlane.xlu0 %785  ;;  %v1462_v47 = vpop.eup %1461  ;;  %v1030_v32 = vmul.f32 %v1460_v41, %v2060_v50  ;;  %v1031_v9 = vmul.f32 %v1460_v41, %v2063_v53 }
 0x17e   :  { %v1242_v3 = vadd.f32 %v2443_v22, %v1135_v29  ;;  %v1243_v12 = vadd.f32 %v2445_v13, %v1136_v28  ;;  %v1464_v51 = vpop.eup %1463  ;;  %v1032_v30 = vmul.f32 %v1462_v47, %v2074_v63  ;;  %v1033_v35 = vmul.f32 %v1462_v47, %v2077_v11 }
 0x17f   :  { %1473 = vrsqrt.f32 %v928_v59  ;;  %v883_v55 = vmul.f32 0.00390625, %v783_v39  ;;  %v1137_v33 = vmul.f32 %v2439_v56, %v1030_v32  ;;  %v1138_v36 = vmul.f32 %v2441_v16, %v1031_v9 }
 0x180   :  { %1338 = vst [vmem:[#allocation7 + $0xa0] sm:$0xff] %v1242_v3  ;;  %1339 = vst [vmem:[#allocation7 + $0xa8] sm:$0xff] %v1243_v12  ;;  %v1034_v10 = vmul.f32 %v1464_v51, %v2080_v49  ;;  %v1035_v45 = vmul.f32 %v1464_v51, %v2083_v5  ;;  %v1139_v50 = vmul.f32 %v2439_v56, %v1032_v30  ;;  %1475 = vrsqrt.f32 %v929_v18  ;;  %v789_v4 = vpop.xlane.xlu1 %788  ;;  %v3025_v51 = vld [vmem:[#allocation60_spill] sm:$0xff] }
 0x181   :  { %v1140_v53 = vmul.f32 %v2441_v16, %v1033_v35  ;;  %v931_v63 = vadd.f32 1e-12, %v883_v55  ;;  %v792_v11 = vpop.xlane.xlu0 %791  ;;  %v1244_v14 = vadd.f32 %v2443_v22, %v1137_v33  ;;  %v1245_v7 = vadd.f32 %v2445_v13, %v1138_v36 }
 0x182   :  { %v1141_v2 = vmul.f32 %v2439_v56, %v1034_v10  ;;  %v1142_v1 = vmul.f32 %v2441_v16, %v1035_v45  ;;  %v1466_v58 = vpop.eup %1465  ;;  %v1246_v49 = vadd.f32 %v2443_v22, %v1139_v50  ;;  %1477 = vrsqrt.f32 %v930_v21  ;;  %v3024_v21 = vld [vmem:[#allocation59_spill] sm:$0xff]  ;;  %v3027_v45 = vld [vmem:[#allocation62_spill] sm:$0xff] }
 0x183   :  { %v1247_v5 = vadd.f32 %v2445_v13, %v1140_v53  ;;  %v884_v23 = vmul.f32 0.00390625, %v786_v52  ;;  %1340 = vst [vmem:[#allocation7 + $0xb0] sm:$0xff] %v1244_v14  ;;  %1341 = vst [vmem:[#allocation7 + $0xb8] sm:$0xff] %v1245_v7  ;;  %v1036_v34 = vmul.f32 %v1466_v58, %v2094_v19  ;;  %v1037_v42 = vmul.f32 %v1466_v58, %v2097_v24  ;;  %v3028_v53 = vld [vmem:[#allocation63_spill] sm:$0xff] }
 0x184   :  { %v1248_v31 = vadd.f32 %v2443_v22, %v1141_v2  ;;  %v1249_v61 = vadd.f32 %v2445_v13, %v1142_v1  ;;  %v1468_v38 = vpop.eup %1467  ;;  %1342 = vst [vmem:[#allocation7 + $0xc0] sm:$0xff] %v1246_v49  ;;  %1479 = vrsqrt.f32 %v931_v63  ;;  %v885_v8 = vmul.f32 0.00390625, %v789_v4  ;;  %v795_v59 = vpop.xlane.xlu1 %794  ;;  %v3029_v49 = vld [vmem:[#allocation11_spill] sm:$0xff] }
 0x185   :  { %1343 = vst [vmem:[#allocation7 + $0xc8] sm:$0xff] %v1247_v5  ;;  %v932_v40 = vadd.f32 1e-12, %v884_v23  ;;  %v886_v60 = vmul.f32 0.00390625, %v792_v11  ;;  %v2533_v62 = vpop.xlane.xlu0 %797  ;;  %v1470_v44 = vpop.eup %1469  ;;  %v1143_v29 = vmul.f32 %v2439_v56, %v1036_v34  ;;  %v1144_v28 = vmul.f32 %v2441_v16, %v1037_v42  ;;  %v3030_v23 = vld [vmem:[#allocation12_spill] sm:$0xff] }
 0x186   :  { %1344 = vst [vmem:[#allocation7 + $0xd0] sm:$0xff] %v1248_v31  ;;  %1345 = vst [vmem:[#allocation7 + $0xd8] sm:$0xff] %v1249_v61  ;;  %v1038_v19 = vmul.f32 %v1468_v38, %v2100_v17  ;;  %v1039_v24 = vmul.f32 %v1468_v38, %v2103_v25  ;;  %v1472_v41 = vpop.eup %1471  ;;  %v1040_v18 = vmul.f32 %v1470_v44, %v2114_v37  ;;  %v933_v52 = vadd.f32 1e-12, %v885_v8  ;;  %v3026_v37 = vld [vmem:[#allocation61_spill] sm:$0xff] }
 0x187   :  { %v1041_v39 = vmul.f32 %v1470_v44, %v3024_v21  ;;  %1481 = vrsqrt.f32 %v932_v40  ;;  %v1250_v47 = vadd.f32 %v2443_v22, %v1143_v29  ;;  %v1251_v3 = vadd.f32 %v2445_v13, %v1144_v28  ;;  %v3032_v21 = vld [vmem:[#allocation14_spill] sm:$0xff] }
 0x188   :  { %v1145_v12 = vmul.f32 %v2439_v56, %v1038_v19  ;;  %v1146_v32 = vmul.f32 %v2441_v16, %v1039_v24  ;;  %v1147_v17 = vmul.f32 %v2439_v56, %v1040_v18  ;;  %v1042_v30 = vmul.f32 %v1472_v41, %v3025_v51  ;;  %v2549_v55 = vpop.xlane.xlu1 %800 }
 0x189   :  { %v1474_v9 = vpop.eup %1473  ;;  %v1148_v25 = vmul.f32 %v2441_v16, %v1041_v39  ;;  %v1043_v35 = vmul.f32 %v1472_v41, %v3026_v37  ;;  %v2551_v33 = vpop.xlane.xlu0 %803  ;;  %1346 = vst [vmem:[#allocation7 + $0xe0] sm:$0xff] %v1250_v47  ;;  %1347 = vst [vmem:[#allocation7 + $0xe8] sm:$0xff] %v1251_v3  ;;  %1483 = vrsqrt.f32 %v933_v52  ;;  %v934_v38 = vadd.f32 1e-12, %v886_v60  ;;  %v3031_v41 = vld [vmem:[#allocation13_spill] sm:$0xff]  ;;  %v3033_v3 = vld [vmem:[#allocation15_spill] sm:$0xff] }
 0x18a   :  { %v1252_v36 = vadd.f32 %v2443_v22, %v1145_v12  ;;  %v1253_v10 = vadd.f32 %v2445_v13, %v1146_v32  ;;  %v1044_v50 = vmul.f32 %v1474_v9, %v3027_v45  ;;  %v1045_v63 = vmul.f32 %v1474_v9, %v3028_v53  ;;  %v1476_v4 = vpop.eup %1475  ;;  %v3034_v32 = vld [vmem:[#allocation16_spill] sm:$0xff]  ;;  %v3035_v45 = vld [vmem:[#allocation17_spill] sm:$0xff]  ;;  %v3036_v53 = vld [vmem:[#allocation18_spill] sm:$0xff] }
 0x18b   :  { %v1254_v11 = vadd.f32 %v2443_v22, %v1147_v17  ;;  %v1255_v14 = vadd.f32 %v2445_v13, %v1148_v25  ;;  %v1149_v7 = vmul.f32 %v2439_v56, %v1042_v30  ;;  %v1150_v2 = vmul.f32 %v2441_v16, %v1043_v35 }
 0x18c   :  { %1348 = vst [vmem:[#allocation7 + $0xf0] sm:$0xff] %v1252_v36  ;;  %1349 = vst [vmem:[#allocation7 + $0xf8] sm:$0xff] %v1253_v10  ;;  %v1151_v1 = vmul.f32 %v2439_v56, %v1044_v50  ;;  %v1152_v58 = vmul.f32 %v2441_v16, %v1045_v63  ;;  %v1046_v5 = vmul.f32 %v1476_v4, %v3029_v49  ;;  %v1478_v61 = vpop.eup %1477  ;;  %v807_v40 = vpop.xlane.xlu1 %806  ;;  %1485 = vrsqrt.f32 %v934_v38 }
 0x18d   :  { %v1047_v31 = vmul.f32 %v1476_v4, %v3030_v23  ;;  %1350 = vst [vmem:[#allocation7 + $0x100] sm:$0xff] %v1254_v11  ;;  %1351 = vst [vmem:[#allocation7 + $0x108] sm:$0xff] %v1255_v14  ;;  %v1256_v34 = vadd.f32 %v2443_v22, %v1149_v7  ;;  %v1257_v42 = vadd.f32 %v2445_v13, %v1150_v2  ;;  %v810_v8 = vpop.xlane.xlu0 %809  ;;  %v887_v52 = vmul.f32 0.00390625, %v795_v59 }
 0x18e   :  { %v1258_v44 = vadd.f32 %v2443_v22, %v1151_v1  ;;  %v1259_v29 = vadd.f32 %v2445_v13, %v1152_v58  ;;  %v1153_v28 = vmul.f32 %v2439_v56, %v1046_v5  ;;  %v1480_v24 = vpop.eup %1479  ;;  %v1048_v18 = vmul.f32 %v1478_v61, %v3031_v41 }
 0x18f   :  { %v1154_v19 = vmul.f32 %v2441_v16, %v1047_v31  ;;  %1352 = vst [vmem:[#allocation7 + $0x110] sm:$0xff] %v1256_v34  ;;  %1353 = vst [vmem:[#allocation7 + $0x118] sm:$0xff] %v1257_v42  ;;  %v1049_v39 = vmul.f32 %v1478_v61, %v3032_v21  ;;  %v1050_v12 = vmul.f32 %v1480_v24, %v3033_v3  ;;  %v935_v30 = vadd.f32 1e-12, %v887_v52 }
 0x190   :  { %1354 = vst [vmem:[#allocation7 + $0x120] sm:$0xff] %v1258_v44  ;;  %1355 = vst [vmem:[#allocation7 + $0x128] sm:$0xff] %v1259_v29  ;;  %v1260_v60 = vadd.f32 %v2443_v22, %v1153_v28  ;;  %v1051_v9 = vmul.f32 %v1480_v24, %v3034_v32  ;;  %v1155_v25 = vmul.f32 %v2439_v56, %v1048_v18  ;;  %v888_v37 = vmul.f32 0.00390625, %v2533_v62  ;;  %v813_v35 = vpop.xlane.xlu1 %812  ;;  %v3037_v28 = vld [vmem:[#allocation19_spill] sm:$0xff] }
 0x191   :  { %v1261_v47 = vadd.f32 %v2445_v13, %v1154_v19  ;;  %v1482_v17 = vpop.eup %1481  ;;  %v1156_v51 = vmul.f32 %v2441_v16, %v1049_v39  ;;  %v816_v59 = vpop.xlane.xlu0 %815  ;;  %v1157_v36 = vmul.f32 %v2439_v56, %v1050_v12  ;;  %1487 = vrsqrt.f32 %v935_v30 }
 0x192   :  { %1356 = vst [vmem:[#allocation7 + $0x130] sm:$0xff] %v1260_v60  ;;  %v1158_v10 = vmul.f32 %v2441_v16, %v1051_v9  ;;  %v1052_v50 = vmul.f32 %v1482_v17, %v3035_v45  ;;  %v1053_v63 = vmul.f32 %v1482_v17, %v3036_v53  ;;  %v1262_v4 = vadd.f32 %v2443_v22, %v1155_v25 }
 0x193   :  { %1357 = vst [vmem:[#allocation7 + $0x138] sm:$0xff] %v1261_v47  ;;  %v1263_v11 = vadd.f32 %v2445_v13, %v1156_v51  ;;  %v936_v14 = vadd.f32 1e-12, %v888_v37  ;;  %v1264_v62 = vadd.f32 %v2443_v22, %v1157_v36  ;;  %v889_v58 = vmul.f32 0.00390625, %v2549_v55  ;;  %v1484_v42 = vpop.eup %1483  ;;  %v3038_v55 = vld [vmem:[#allocation20_spill] sm:$0xff]  ;;  %v3039_v47 = vld [vmem:[#allocation21_spill] sm:$0xff] }
 0x194   :  { %v1265_v7 = vadd.f32 %v2445_v13, %v1158_v10  ;;  %v1159_v2 = vmul.f32 %v2439_v56, %v1052_v50  ;;  %v1160_v1 = vmul.f32 %v2441_v16, %v1053_v63  ;;  %1358 = vst [vmem:[#allocation7 + $0x140] sm:$0xff] %v1262_v4  ;;  %v890_v49 = vmul.f32 0.00390625, %v2551_v33  ;;  %v819_v23 = vpop.xlane.xlu1 %818  ;;  %v3041_v4 = vld [vmem:[#allocation23_spill] sm:$0xff] }
 0x195   :  { %1359 = vst [vmem:[#allocation7 + $0x148] sm:$0xff] %v1263_v11  ;;  %1489 = vrsqrt.f32 %v936_v14  ;;  %v891_v5 = vmul.f32 0.00390625, %v807_v40  ;;  %v822_v31 = vpop.xlane.xlu0 %821  ;;  %1360 = vst [vmem:[#allocation7 + $0x150] sm:$0xff] %v1264_v62  ;;  %v937_v38 = vadd.f32 1e-12, %v889_v58  ;;  %v892_v29 = vmul.f32 0.00390625, %v810_v8 }
 0x196   :  { %1361 = vst [vmem:[#allocation7 + $0x158] sm:$0xff] %v1265_v7  ;;  %v1266_v61 = vadd.f32 %v2443_v22, %v1159_v2  ;;  %v1267_v34 = vadd.f32 %v2445_v13, %v1160_v1  ;;  %v938_v44 = vadd.f32 1e-12, %v890_v49  ;;  %v1054_v19 = vmul.f32 %v1484_v42, %v3037_v28  ;;  %v1486_v33 = vpop.eup %1485  ;;  %v3040_v8 = vld [vmem:[#allocation22_spill] sm:$0xff]  ;;  %v3042_v14 = vld [vmem:[#allocation24_spill] sm:$0xff] }
 0x197   :  { %v1055_v24 = vmul.f32 %v1484_v42, %v3038_v55  ;;  %1491 = vrsqrt.f32 %v937_v38  ;;  %v939_v40 = vadd.f32 1e-12, %v891_v5  ;;  %v893_v41 = vmul.f32 0.00390625, %v813_v35 }
 0x198   :  { %1362 = vst [vmem:[#allocation7 + $0x160] sm:$0xff] %v1266_v61  ;;  %1363 = vst [vmem:[#allocation7 + $0x168] sm:$0xff] %v1267_v34  ;;  %v894_v18 = vmul.f32 0.00390625, %v816_v59  ;;  %v825_v21 = vpop.xlane.xlu1 %824  ;;  %v1161_v52 = vmul.f32 %v2439_v56, %v1054_v19  ;;  %v1056_v3 = vmul.f32 %v1486_v33, %v3039_v47  ;;  %v1057_v12 = vmul.f32 %v1486_v33, %v3040_v8  ;;  %v3044_v61 = vld [vmem:[#allocation26_spill] sm:$0xff] }
 0x199   :  { %v828_v39 = vpop.xlane.xlu0 %827  ;;  %v1162_v60 = vmul.f32 %v2441_v16, %v1055_v24  ;;  %1493 = vrsqrt.f32 %v938_v44  ;;  %v940_v32 = vadd.f32 1e-12, %v892_v29  ;;  %v895_v9 = vmul.f32 0.00390625, %v819_v23  ;;  %v3043_v23 = vld [vmem:[#allocation25_spill] sm:$0xff] }
 0x19a   :  { %v896_v17 = vmul.f32 0.00390625, %v822_v31  ;;  %v1268_v25 = vadd.f32 %v2443_v22, %v1161_v52  ;;  %v1163_v30 = vmul.f32 %v2439_v56, %v1056_v3  ;;  %v1164_v37 = vmul.f32 %v2441_v16, %v1057_v12  ;;  %v3046_v3 = vld [vmem:[#allocation28_spill] sm:$0xff] }
 0x19b   :  { %v1269_v51 = vadd.f32 %v2445_v13, %v1162_v60  ;;  %v1488_v35 = vpop.eup %1487  ;;  %1495 = vrsqrt.f32 %v939_v40  ;;  %v941_v59 = vadd.f32 1e-12, %v893_v41  ;;  %v942_v36 = vadd.f32 1e-12, %v894_v18  ;;  %v3045_v60 = vld [vmem:[#allocation27_spill] sm:$0xff] }
 0x19c   :  { %v897_v10 = vmul.f32 0.00390625, %v825_v21  ;;  %v831_v45 = vpop.xlane.xlu1 %830  ;;  %1364 = vst [vmem:[#allocation7 + $0x170] sm:$0xff] %v1268_v25  ;;  %v1270_v53 = vadd.f32 %v2443_v22, %v1163_v30  ;;  %v1271_v63 = vadd.f32 %v2445_v13, %v1164_v37  ;;  %v1058_v11 = vmul.f32 %v1488_v35, %v3041_v4 }
 0x19d   :  { %v834_v50 = vpop.xlane.xlu0 %833  ;;  %1365 = vst [vmem:[#allocation7 + $0x178] sm:$0xff] %v1269_v51  ;;  %v1059_v62 = vmul.f32 %v1488_v35, %v3042_v14  ;;  %1497 = vrsqrt.f32 %v940_v32  ;;  %v943_v2 = vadd.f32 1e-12, %v895_v9  ;;  %v944_v1 = vadd.f32 1e-12, %v896_v17  ;;  %v3047_v35 = vld [vmem:[#allocation29_spill] sm:$0xff] }
 0x19e   :  { %v898_v58 = vmul.f32 0.00390625, %v828_v39  ;;  %1366 = vst [vmem:[#allocation7 + $0x180] sm:$0xff] %v1270_v53  ;;  %1367 = vst [vmem:[#allocation7 + $0x188] sm:$0xff] %v1271_v63  ;;  %v1165_v49 = vmul.f32 %v2439_v56, %v1058_v11  ;;  %1499 = vrsqrt.f32 %v941_v59  ;;  %v945_v42 = vadd.f32 1e-12, %v897_v10 }
 0x19f   :  { %v1490_v7 = vpop.eup %1489  ;;  %v1166_v5 = vmul.f32 %v2441_v16, %v1059_v62  ;;  %v899_v38 = vmul.f32 0.00390625, %v831_v45  ;;  %v900_v44 = vmul.f32 0.00390625, %v834_v50  ;;  %1501 = vrsqrt.f32 %v942_v36  ;;  %v3048_v36 = vld [vmem:[#allocation30_spill] sm:$0xff] }
 0x1a0   :  { %v1060_v31 = vmul.f32 %v1490_v7, %v3043_v23  ;;  %v1061_v34 = vmul.f32 %v1490_v7, %v3044_v61  ;;  %v837_v29 = vpop.xlane.xlu1 %836  ;;  %v1272_v19 = vadd.f32 %v2443_v22, %v1165_v49  ;;  %v946_v41 = vadd.f32 1e-12, %v898_v58  ;;  %v3050_v49 = vld [vmem:[#allocation32_spill] sm:$0xff]  ;;  %v3051_v61 = vld [vmem:[#allocation33_spill] sm:$0xff] }
 0x1a1   :  { %v840_v28 = vpop.xlane.xlu0 %839  ;;  %v1273_v55 = vadd.f32 %v2445_v13, %v1166_v5  ;;  %v1492_v40 = vpop.eup %1491  ;;  %v901_v18 = vmul.f32 0.00390625, %v837_v29  ;;  %1503 = vrsqrt.f32 %v943_v2  ;;  %v947_v32 = vadd.f32 1e-12, %v899_v38  ;;  %v3049_v2 = vld [vmem:[#allocation31_spill] sm:$0xff]  ;;  %v3052_v38 = vld [vmem:[#allocation34_spill] sm:$0xff] }
 0x1a2   :  { %v1167_v24 = vmul.f32 %v2439_v56, %v1060_v31  ;;  %v1168_v33 = vmul.f32 %v2441_v16, %v1061_v34  ;;  %v902_v21 = vmul.f32 0.00390625, %v840_v28  ;;  %1368 = vst [vmem:[#allocation7 + $0x190] sm:$0xff] %v1272_v19  ;;  %v1062_v47 = vmul.f32 %v1492_v40, %v3045_v60 }
 0x1a3   :  { %1369 = vst [vmem:[#allocation7 + $0x198] sm:$0xff] %v1273_v55  ;;  %v1063_v8 = vmul.f32 %v1492_v40, %v3046_v3  ;;  %v1494_v12 = vpop.eup %1493  ;;  %v948_v9 = vadd.f32 1e-12, %v900_v44  ;;  %v2620_v17 = vadd.f32 1e-12, %v901_v18  ;;  %1505 = vrsqrt.f32 %v944_v1  ;;  %v3053_v40 = vld [vmem:[#allocation35_spill] sm:$0xff] }
 0x1a4   :  { %v1274_v39 = vadd.f32 %v2443_v22, %v1167_v24  ;;  %v1275_v52 = vadd.f32 %v2445_v13, %v1168_v33  ;;  %v843_v25 = vpop.xlane.xlu1 %842  ;;  %v1169_v30 = vmul.f32 %v2439_v56, %v1062_v47  ;;  %v1064_v59 = vmul.f32 %v1494_v12, %v3047_v35 }
 0x1a5   :  { %v846_v51 = vpop.xlane.xlu0 %845  ;;  %v1170_v37 = vmul.f32 %v2441_v16, %v1063_v8  ;;  %v1065_v10 = vmul.f32 %v1494_v12, %v3048_v36  ;;  %v1496_v45 = vpop.eup %1495  ;;  %v2626_v50 = vadd.f32 1e-12, %v902_v21  ;;  %v903_v53 = vmul.f32 0.00390625, %v843_v25  ;;  %v3054_v21 = vld [vmem:[#allocation36_spill] sm:$0xff] }
 0x1a6   :  { %1370 = vst [vmem:[#allocation7 + $0x1a0] sm:$0xff] %v1274_v39  ;;  %1371 = vst [vmem:[#allocation7 + $0x1a8] sm:$0xff] %v1275_v52  ;;  %v904_v63 = vmul.f32 0.00390625, %v846_v51  ;;  %v1276_v4 = vadd.f32 %v2443_v22, %v1169_v30  ;;  %v1171_v14 = vmul.f32 %v2439_v56, %v1064_v59  ;;  %v1066_v58 = vmul.f32 %v1496_v45, %v3049_v2  ;;  %v3056_v59 = vld [vmem:[#allocation38_spill] sm:$0xff] }
 0x1a7   :  { %v1277_v11 = vadd.f32 %v2445_v13, %v1170_v37  ;;  %v1172_v62 = vmul.f32 %v2441_v16, %v1065_v10  ;;  %v1498_v7 = vpop.eup %1497  ;;  %v1067_v5 = vmul.f32 %v1496_v45, %v3050_v49  ;;  %1507 = vrsqrt.f32 %v945_v42  ;;  %v3055_v37 = vld [vmem:[#allocation37_spill] sm:$0xff] }
 0x1a8   :  { %v2634_v23 = vadd.f32 1e-12, %v903_v53  ;;  %1372 = vst [vmem:[#allocation7 + $0x1b0] sm:$0xff] %v1276_v4  ;;  %v1278_v1 = vadd.f32 %v2443_v22, %v1171_v14  ;;  %v1068_v34 = vmul.f32 %v1498_v7, %v3051_v61  ;;  %v1069_v44 = vmul.f32 %v1498_v7, %v3052_v38  ;;  %v849_v29 = vpop.xlane.xlu1 %848  ;;  %v1500_v28 = vpop.eup %1499  ;;  %v3057_v53 = vld [vmem:[#allocation39_spill] sm:$0xff]  ;;  %v3058_v4 = vld [vmem:[#allocation40_spill] sm:$0xff]  ;;  %v3059_v49 = vld [vmem:[#allocation41_spill] sm:$0xff] }
 0x1a9   :  { %1373 = vst [vmem:[#allocation7 + $0x1b8] sm:$0xff] %v1277_v11  ;;  %v1279_v31 = vadd.f32 %v2445_v13, %v1172_v62  ;;  %v1173_v19 = vmul.f32 %v2439_v56, %v1066_v58  ;;  %v1174_v55 = vmul.f32 %v2441_v16, %v1067_v5  ;;  %1509 = vrsqrt.f32 %v946_v41  ;;  %v1502_v52 = vpop.eup %1501  ;;  %v852_v51 = vpop.xlane.xlu0 %851 }
 0x1aa   :  { %v2642_v42 = vadd.f32 1e-12, %v904_v63  ;;  %1374 = vst [vmem:[#allocation7 + $0x1c0] sm:$0xff] %v1278_v1  ;;  %v1175_v24 = vmul.f32 %v2439_v56, %v1068_v34  ;;  %v1176_v33 = vmul.f32 %v2441_v16, %v1069_v44  ;;  %v1070_v18 = vmul.f32 %v1500_v28, %v3053_v40  ;;  %v3060_v1 = vld [vmem:[#allocation42_spill] sm:$0xff] }
 0x1ab   :  { %1375 = vst [vmem:[#allocation7 + $0x1c8] sm:$0xff] %v1279_v31  ;;  %v1071_v39 = vmul.f32 %v1500_v28, %v3054_v21  ;;  %v1280_v60 = vadd.f32 %v2443_v22, %v1173_v19  ;;  %v1281_v47 = vadd.f32 %v2445_v13, %v1174_v55  ;;  %1511 = vrsqrt.f32 %v947_v32  ;;  %v1504_v30 = vpop.eup %1503 }
 0x1ac   :  { %v905_v3 = vmul.f32 0.00390625, %v849_v29  ;;  %v1282_v41 = vadd.f32 %v2443_v22, %v1175_v24  ;;  %v1283_v8 = vadd.f32 %v2445_v13, %v1176_v33  ;;  %v1177_v12 = vmul.f32 %v2439_v56, %v1070_v18  ;;  %v855_v61 = vpop.xlane.xlu1 %854  ;;  %v3061_v33 = vld [vmem:[#allocation43_spill] sm:$0xff]  ;;  %v3062_v18 = vld [vmem:[#allocation44_spill] sm:$0xff] }
 0x1ad   :  { %v1178_v25 = vmul.f32 %v2441_v16, %v1071_v39  ;;  %1376 = vst [vmem:[#allocation7 + $0x1d0] sm:$0xff] %v1280_v60  ;;  %1377 = vst [vmem:[#allocation7 + $0x1d8] sm:$0xff] %v1281_v47  ;;  %v1072_v35 = vmul.f32 %v1502_v52, %v3055_v37  ;;  %v1073_v36 = vmul.f32 %v1502_v52, %v3056_v59  ;;  %1513 = vrsqrt.f32 %v948_v9  ;;  %v1506_v14 = vpop.eup %1505  ;;  %v3063_v60 = vld [vmem:[#allocation45_spill] sm:$0xff] }
 0x1ae   :  { %v953_v10 = vadd.f32 1e-12, %v905_v3  ;;  %1378 = vst [vmem:[#allocation7 + $0x1e0] sm:$0xff] %v1282_v41  ;;  %1379 = vst [vmem:[#allocation7 + $0x1e8] sm:$0xff] %v1283_v8  ;;  %v1284_v32 = vadd.f32 %v2443_v22, %v1177_v12  ;;  %v1074_v63 = vmul.f32 %v1504_v30, %v3057_v53  ;;  %v1075_v11 = vmul.f32 %v1504_v30, %v3058_v4  ;;  %v3064_v3 = vld [vmem:[#allocation46_spill] sm:$0xff]  ;;  %v858_v8 = vpop.xlane.xlu0 %857 }
 0x1af   :  { %v1285_v45 = vadd.f32 %v2445_v13, %v1178_v25  ;;  %v1179_v62 = vmul.f32 %v2439_v56, %v1072_v35  ;;  %v1180_v7 = vmul.f32 %v2441_v16, %v1073_v36  ;;  %1515 = vrsqrt.f32 %v2620_v17  ;;  %v3065_v35 = vld [vmem:[#allocation47_spill] sm:$0xff]  ;;  %v3066_v36 = vld [vmem:[#allocation48_spill] sm:$0xff] }
 0x1b0   :  { %v906_v2 = vmul.f32 0.00390625, %v852_v51  ;;  %1380 = vst [vmem:[#allocation7 + $0x1f0] sm:$0xff] %v1284_v32  ;;  %v1181_v9 = vmul.f32 %v2439_v56, %v1074_v63  ;;  %v1182_v58 = vmul.f32 %v2441_v16, %v1075_v11  ;;  %v1076_v5 = vmul.f32 %v1506_v14, %v3059_v49  ;;  %v3068_v49 = vld [vmem:[#allocation50_spill] sm:$0xff] }
 0x1b1   :  { %1381 = vst [vmem:[#allocation7 + $0x1f8] sm:$0xff] %v1285_v45  ;;  %v1077_v31 = vmul.f32 %v1506_v14, %v3060_v1  ;;  %v1508_v34 = vpop.eup %1507  ;;  %v1286_v38 = vadd.f32 %v2443_v22, %v1179_v62  ;;  %v1287_v44 = vadd.f32 %v2445_v13, %v1180_v7  ;;  %1517 = vrsqrt.f32 %v2626_v50  ;;  %v861_v7 = vpop.xlane.xlu1 %860 }
 0x1b2   :  { %v954_v17 = vadd.f32 1e-12, %v906_v2  ;;  %v1288_v29 = vadd.f32 %v2443_v22, %v1181_v9  ;;  %v1289_v28 = vadd.f32 %v2445_v13, %v1182_v58  ;;  %v1183_v19 = vmul.f32 %v2439_v56, %v1076_v5  ;;  %v3067_v9 = vld [vmem:[#allocation49_spill] sm:$0xff] }
 0x1b3   :  { %v1184_v55 = vmul.f32 %v2441_v16, %v1077_v31  ;;  %v1510_v24 = vpop.eup %1509  ;;  %1382 = vst [vmem:[#allocation7 + $0x200] sm:$0xff] %v1286_v38  ;;  %1383 = vst [vmem:[#allocation7 + $0x208] sm:$0xff] %v1287_v44  ;;  %v1078_v40 = vmul.f32 %v1508_v34, %v3061_v33  ;;  %v1079_v21 = vmul.f32 %v1508_v34, %v3062_v18  ;;  %1519 = vrsqrt.f32 %v2634_v23 }
 0x1b4   :  { %v907_v39 = vmul.f32 0.00390625, %v855_v61  ;;  %1384 = vst [vmem:[#allocation7 + $0x210] sm:$0xff] %v1288_v29  ;;  %1385 = vst [vmem:[#allocation7 + $0x218] sm:$0xff] %v1289_v28  ;;  %v1290_v50 = vadd.f32 %v2443_v22, %v1183_v19  ;;  %v1080_v47 = vmul.f32 %v1510_v24, %v3063_v60  ;;  %v1081_v41 = vmul.f32 %v1510_v24, %v3064_v3  ;;  %v3069_v61 = vld [vmem:[#allocation51_spill] sm:$0xff] }
 0x1b5   :  { %v1291_v52 = vadd.f32 %v2445_v13, %v1184_v55  ;;  %v1512_v12 = vpop.eup %1511  ;;  %v1185_v25 = vmul.f32 %v2439_v56, %v1078_v40  ;;  %v1186_v51 = vmul.f32 %v2441_v16, %v1079_v21  ;;  %1521 = vrsqrt.f32 %v2642_v42 }
 0x1b6   :  { %v955_v23 = vadd.f32 1e-12, %v907_v39  ;;  %1386 = vst [vmem:[#allocation7 + $0x220] sm:$0xff] %v1290_v50  ;;  %v1187_v30 = vmul.f32 %v2439_v56, %v1080_v47  ;;  %v1188_v37 = vmul.f32 %v2441_v16, %v1081_v41  ;;  %v1082_v59 = vmul.f32 %v1512_v12, %v3065_v35 }
 0x1b7   :  { %1387 = vst [vmem:[#allocation7 + $0x228] sm:$0xff] %v1291_v52  ;;  %v1083_v32 = vmul.f32 %v1512_v12, %v3066_v36  ;;  %v1514_v45 = vpop.eup %1513  ;;  %v1292_v53 = vadd.f32 %v2443_v22, %v1185_v25  ;;  %v1293_v63 = vadd.f32 %v2445_v13, %v1186_v51  ;;  %1523 = vrsqrt.f32 %v953_v10 }
 0x1b8   :  { %v908_v4 = vmul.f32 0.00390625, %v858_v8  ;;  %v1294_v42 = vadd.f32 %v2443_v22, %v1187_v30  ;;  %v1295_v11 = vadd.f32 %v2445_v13, %v1188_v37  ;;  %v1189_v14 = vmul.f32 %v2439_v56, %v1082_v59 }
 0x1b9   :  { %v1190_v62 = vmul.f32 %v2441_v16, %v1083_v32  ;;  %v1516_v2 = vpop.eup %1515  ;;  %1388 = vst [vmem:[#allocation7 + $0x230] sm:$0xff] %v1292_v53  ;;  %1389 = vst [vmem:[#allocation7 + $0x238] sm:$0xff] %v1293_v63  ;;  %v1084_v58 = vmul.f32 %v1514_v45, %v3067_v9  ;;  %v1085_v5 = vmul.f32 %v1514_v45, %v3068_v49  ;;  %1525 = vrsqrt.f32 %v954_v17  ;;  %v3072_v49 = vld [vmem:[#allocation54_spill] sm:$0xff] }
 0x1ba   :  { %v956_v1 = vadd.f32 1e-12, %v908_v4  ;;  %1390 = vst [vmem:[#allocation7 + $0x240] sm:$0xff] %v1294_v42  ;;  %1391 = vst [vmem:[#allocation7 + $0x248] sm:$0xff] %v1295_v11  ;;  %v1296_v10 = vadd.f32 %v2443_v22, %v1189_v14  ;;  %v1086_v34 = vmul.f32 %v1516_v2, %v3069_v61  ;;  %v1087_v38 = vmul.f32 %v1516_v2, %v2343_v15 }
 0x1bb   :  { %v1297_v31 = vadd.f32 %v2445_v13, %v1190_v62  ;;  %v1518_v44 = vpop.eup %1517  ;;  %v1191_v29 = vmul.f32 %v2439_v56, %v1084_v58  ;;  %v1192_v28 = vmul.f32 %v2441_v16, %v1085_v5  ;;  %1527 = vrsqrt.f32 %v955_v23  ;;  %v3071_v62 = vld [vmem:[#allocation53_spill] sm:$0xff] }
 0x1bc   :  { %v909_v19 = vmul.f32 0.00390625, %v861_v7  ;;  %1392 = vst [vmem:[#allocation7 + $0x250] sm:$0xff] %v1296_v10  ;;  %v1193_v17 = vmul.f32 %v2439_v56, %v1086_v34  ;;  %v1194_v55 = vmul.f32 %v2441_v16, %v1087_v38  ;;  %v1088_v24 = vmul.f32 %v1518_v44, %v2354_v0  ;;  %v3070_v0 = vld [vmem:[#allocation52_spill] sm:$0xff] }
 0x1bd   :  { %1393 = vst [vmem:[#allocation7 + $0x258] sm:$0xff] %v1297_v31  ;;  %v1089_v33 = vmul.f32 %v1518_v44, %v2357_v57  ;;  %v1520_v40 = vpop.eup %1519  ;;  %v1298_v15 = vadd.f32 %v2443_v22, %v1191_v29  ;;  %v1299_v18 = vadd.f32 %v2445_v13, %v1192_v28  ;;  %1529 = vrsqrt.f32 %v956_v1  ;;  %v3073_v1 = vld [vmem:[#allocation55_spill] sm:$0xff]  ;;  %v3074_v28 = vld [vmem:[#allocation56_spill] sm:$0xff] }
 0x1be   :  { %v957_v21 = vadd.f32 1e-12, %v909_v19  ;;  %v1300_v39 = vadd.f32 %v2443_v22, %v1193_v17  ;;  %v1301_v50 = vadd.f32 %v2445_v13, %v1194_v55  ;;  %v1195_v52 = vmul.f32 %v2439_v56, %v1088_v24  ;;  %v3075_v17 = vld [vmem:[#allocation57_spill] sm:$0xff] }
 0x1bf   :  { %v1196_v60 = vmul.f32 %v2441_v16, %v1089_v33  ;;  %v1522_v47 = vpop.eup %1521  ;;  %1394 = vst [vmem:[#allocation7 + $0x260] sm:$0xff] %v1298_v15  ;;  %1395 = vst [vmem:[#allocation7 + $0x268] sm:$0xff] %v1299_v18  ;;  %v1090_v57 = vmul.f32 %v1520_v40, %v3070_v0  ;;  %v1091_v3 = vmul.f32 %v1520_v40, %v2363_v43 }
 0x1c0   :  { %1531 = vrsqrt.f32 %v957_v21  ;;  %1396 = vst [vmem:[#allocation7 + $0x270] sm:$0xff] %v1300_v39  ;;  %1397 = vst [vmem:[#allocation7 + $0x278] sm:$0xff] %v1301_v50  ;;  %v1302_v41 = vadd.f32 %v2443_v22, %v1195_v52  ;;  %v1092_v12 = vmul.f32 %v1522_v47, %v2374_v26  ;;  %v1093_v25 = vmul.f32 %v1522_v47, %v2377_v48 }
 0x1c1   :  { %v1303_v8 = vadd.f32 %v2445_v13, %v1196_v60  ;;  %v1524_v51 = vpop.eup %1523  ;;  %v1197_v23 = vmul.f32 %v2439_v56, %v1090_v57  ;;  %v1198_v30 = vmul.f32 %v2441_v16, %v1091_v3 }
 0x1c2   :  { %1398 = vst [vmem:[#allocation7 + $0x280] sm:$0xff] %v1302_v41  ;;  %v1199_v43 = vmul.f32 %v2439_v56, %v1092_v12  ;;  %v1200_v37 = vmul.f32 %v2441_v16, %v1093_v25  ;;  %v1094_v35 = vmul.f32 %v1524_v51, %v2380_v6  ;;  %v1095_v59 = vmul.f32 %v1524_v51, %v2383_v20 }
 0x1c3   :  { %1399 = vst [vmem:[#allocation7 + $0x288] sm:$0xff] %v1303_v8  ;;  %v1526_v36 = vpop.eup %1525  ;;  %v1304_v26 = vadd.f32 %v2443_v22, %v1197_v23  ;;  %v1305_v48 = vadd.f32 %v2445_v13, %v1198_v30 }
 0x1c4   :  { %v1306_v32 = vadd.f32 %v2443_v22, %v1199_v43  ;;  %v1307_v45 = vadd.f32 %v2445_v13, %v1200_v37  ;;  %v1201_v53 = vmul.f32 %v2439_v56, %v1094_v35  ;;  %v1202_v63 = vmul.f32 %v2441_v16, %v1095_v59 }
 0x1c5   :  { %v1528_v4 = vpop.eup %1527  ;;  %1400 = vst [vmem:[#allocation7 + $0x290] sm:$0xff] %v1304_v26  ;;  %1401 = vst [vmem:[#allocation7 + $0x298] sm:$0xff] %v1305_v48  ;;  %v1096_v6 = vmul.f32 %v1526_v36, %v2394_v46  ;;  %v1097_v20 = vmul.f32 %v1526_v36, %v2397_v27 }
 0x1c6   :  { %1402 = vst [vmem:[#allocation7 + $0x2a0] sm:$0xff] %v1306_v32  ;;  %1403 = vst [vmem:[#allocation7 + $0x2a8] sm:$0xff] %v1307_v45  ;;  %v1308_v42 = vadd.f32 %v2443_v22, %v1201_v53  ;;  %v1309_v11 = vadd.f32 %v2445_v13, %v1202_v63  ;;  %v1098_v14 = vmul.f32 %v1528_v4, %v2400_v54 }
 0x1c7   :  { %v1099_v7 = vmul.f32 %v1528_v4, %v3071_v62  ;;  %v1530_v2 = vpop.eup %1529  ;;  %v1203_v9 = vmul.f32 %v2439_v56, %v1096_v6  ;;  %v1204_v58 = vmul.f32 %v2441_v16, %v1097_v20 }
 0x1c8   :  { %1404 = vst [vmem:[#allocation7 + $0x2b0] sm:$0xff] %v1308_v42  ;;  %1405 = vst [vmem:[#allocation7 + $0x2b8] sm:$0xff] %v1309_v11  ;;  %v1205_v46 = vmul.f32 %v2439_v56, %v1098_v14  ;;  %v1100_v5 = vmul.f32 %v1530_v2, %v3072_v49  ;;  %v1101_v10 = vmul.f32 %v1530_v2, %v3073_v1 }
 0x1c9   :  { %v1206_v27 = vmul.f32 %v2441_v16, %v1099_v7  ;;  %v1310_v54 = vadd.f32 %v2443_v22, %v1203_v9  ;;  %v1311_v61 = vadd.f32 %v2445_v13, %v1204_v58 }
 0x1ca   :  { %v1532_v31 = vpop.eup %1531  ;;  %v1312_v34 = vadd.f32 %v2443_v22, %v1205_v46  ;;  %v1207_v44 = vmul.f32 %v2439_v56, %v1100_v5  ;;  %v1208_v29 = vmul.f32 %v2441_v16, %v1101_v10 }
 0x1cb   :  { %v1313_v38 = vadd.f32 %v2445_v13, %v1206_v27  ;;  %1406 = vst [vmem:[#allocation7 + $0x2c0] sm:$0xff] %v1310_v54  ;;  %1407 = vst [vmem:[#allocation7 + $0x2c8] sm:$0xff] %v1311_v61  ;;  %v1102_v19 = vmul.f32 %v1532_v31, %v3074_v28  ;;  %v1103_v55 = vmul.f32 %v1532_v31, %v3075_v17 }
 0x1cc   :  { %1408 = vst [vmem:[#allocation7 + $0x2d0] sm:$0xff] %v1312_v34  ;;  %v1314_v24 = vadd.f32 %v2443_v22, %v1207_v44  ;;  %v1315_v33 = vadd.f32 %v2445_v13, %v1208_v29 }
 0x1cd   :  { %1409 = vst [vmem:[#allocation7 + $0x2d8] sm:$0xff] %v1313_v38  ;;  %v1209_v40 = vmul.f32 %v2439_v56, %v1102_v19  ;;  %v1210_v15 = vmul.f32 %v2441_v16, %v1103_v55 }
 0x1ce   :  { %1410 = vst [vmem:[#allocation7 + $0x2e0] sm:$0xff] %v1314_v24  ;;  %1411 = vst [vmem:[#allocation7 + $0x2e8] sm:$0xff] %v1315_v33 }
 0x1cf   :  { %v1316_v18 = vadd.f32 %v2443_v22, %v1209_v40  ;;  %v1317_v21 = vadd.f32 %v2445_v13, %v1210_v15 }
 0x1d1   :  { %1412 = vst [vmem:[#allocation7 + $0x2f0] sm:$0xff] %v1316_v18  ;;  %1413 = vst [vmem:[#allocation7 + $0x2f8] sm:$0xff] %v1317_v21 }
 0x1d2   :  { %1588 = shalt.err (!%p1585_p6)
}
 0x1d3   :  { %s1589_s20 = scalar_lea.hbm %s2775_s4, 12288 }
 0x1d4   :  { %p1590_p7 = scmp.ne.s32.totalorder %s2775_s4, %s1589_s20  ;;  %p1593_p8 = scmp.lt.u32.totalorder %s1589_s20, %s2775_s4 }
 0x1d6   :  { %p1595_p9 = pnand %p1593_p8, %p1590_p7 }
 0x1d8   :  { %1598 = shalt.err (!%p1595_p9)
}
 0x1d9   :  { %1425 = dma.vmem_to_hbm [thread:$0]  %s1420_s3, 12288, %s2775_s4, [#allocation4], %s1606_s25, %s1606_s25, %s1607_s26  }
 0x1da   :  { %1603 = dma.done.wait [#allocation4], 12288  }
 0x1db   :  { %1604 = vsyncadd [#allocation4], 4294955008 }
 0x1dc   :  { %1429 = vsyncpa [#allocation3], 1 }
 0x1dd   :  { %1430 = vsyncpa [#allocation6], 1 }
 0x1de   :  { %1431 = vsyncpa [#allocation4], 1 }

</bundles_post_ra>
